<compile_context>
chip_gen: v7x
topology: tpu7x:2x2x1
jax: 0.10.0
libtpu: 0.0.40
codegen_flags: <defaults>
</compile_context>

<pallas_src>
from typing import NamedTuple

import jax
import jax.numpy as jnp
from jax.experimental import pallas as pl
from jax.experimental.pallas import tpu as pltpu


def _round_up(x: int, m: int) -> int:
    return ((x + m - 1) // m) * m


class PackedProjectorWeights(NamedTuple):
    """Pre-transposed / pre-padded weights (build once, reuse every call)."""
    w13: jax.Array        # (n_h_tiles, D_in, 2*tile_h)  -- [w1^T tile | w3^T tile]
    w2t: jax.Array        # (Hp, Np)                      -- padded w2^T
    input_dim: int
    half_hidden: int      # un-padded hidden//2
    d_model: int          # un-padded d_model
    tile_h: int
    tile_n: int


def pack_projector_weights(w1, w2, w3, *, tile_h: int = 256, tile_n: int = 256):
    """w1/w3: (hidden//2, D_in), w2: (d_model, hidden//2)  (PyTorch nn.Linear layout)."""
    half_hidden, d_in = w1.shape
    d_model = w2.shape[0]
    assert w3.shape == (half_hidden, d_in)
    assert w2.shape == (d_model, half_hidden)

    th = min(_round_up(tile_h, 128), _round_up(half_hidden, 128))
    tn = min(_round_up(tile_n, 128), _round_up(d_model, 128))
    hp = _round_up(half_hidden, th)
    np_ = _round_up(d_model, tn)
    n_h = hp // th

    # (out, in) -> (in, out), zero-pad hidden dim, interleave per hidden tile so the
    # gate+up projection is a single (tm, D_in) @ (D_in, 2*th) matmul per tile.
    w1_t = jnp.pad(jnp.transpose(w1), ((0, 0), (0, hp - half_hidden)))  # (D_in, Hp)
    w3_t = jnp.pad(jnp.transpose(w3), ((0, 0), (0, hp - half_hidden)))  # (D_in, Hp)
    w13 = jnp.concatenate(
        [w1_t.reshape(d_in, n_h, th), w3_t.reshape(d_in, n_h, th)], axis=-1)
    w13 = jnp.transpose(w13, (1, 0, 2))                                  # (n_h, D_in, 2*th)

    w2_t = jnp.pad(jnp.transpose(w2),
                   ((0, hp - half_hidden), (0, np_ - d_model)))          # (Hp, Np)

    return PackedProjectorWeights(w13=w13, w2t=w2_t, input_dim=d_in,
                                  half_hidden=half_hidden, d_model=d_model,
                                  tile_h=th, tile_n=tn)


def _swiglu_mlp_kernel(x_ref, w13_ref, w2_ref, o_ref, acc_ref):
    """One (M-tile, N-tile, H-tile) step.

    x_ref  : (tm, D_in)        VMEM, input dtype
    w13_ref: (D_in, 2*th)      VMEM, [w1^T tile | w3^T tile]
    w2_ref : (th, tn)          VMEM
    o_ref  : (tm, tn)          VMEM, written on the last H step
    acc_ref: (tm, tn) f32      VMEM scratch accumulator (resident across H)
    """
    th = w2_ref.shape[0]

    @pl.when(pl.program_id(2) == 0)
    def _():
        acc_ref[...] = jnp.zeros_like(acc_ref)

    # Fused gate+up projection: one MXU matmul, native input dtype, f32 accumulation.
    g = jnp.dot(x_ref[...], w13_ref[...], preferred_element_type=jnp.float32)
    h1 = g[:, :th]
    h3 = g[:, th:]
    hidden = (h1 * jax.nn.sigmoid(h1)) * h3            # SwiGLU (split_inputs=True)

    # Partial down projection, accumulated over H tiles.
    acc_ref[...] += jnp.dot(hidden.astype(w2_ref.dtype), w2_ref[...],
                            preferred_element_type=jnp.float32)

    @pl.when(pl.program_id(2) == pl.num_programs(2) - 1)
    def _():
        o_ref[...] = acc_ref[...].astype(o_ref.dtype)
    # dropout(p=0.0) is the identity -> nothing to do.
    # TODO(synk): stochastic dropout (p > 0) would need pltpu.prng_* inside the kernel.


def image_projector_mlp(x, packed: PackedProjectorWeights, *, tile_m: int = 256):
    """x: (B, S, input_dim) -> (B, S, d_model)."""
    b, s, d_in = x.shape
    assert d_in == packed.input_dim
    th, tn = packed.tile_h, packed.tile_n
    n_h, _, two_th = packed.w13.shape
    hp, np_ = packed.w2t.shape
    assert two_th == 2 * th and hp == n_h * th

    m = b * s
    tm = min(_round_up(tile_m, 8), _round_up(m, 8))
    mp = _round_up(m, tm)

    x2d = x.reshape(m, d_in)
    if mp != m:
        x2d = jnp.pad(x2d, ((0, mp - m), (0, 0)))

    grid = (mp // tm, np_ // tn, n_h)

    wbytes = packed.w13.dtype.itemsize
    xbytes = x.dtype.itemsize
    cost = pl.CostEstimate(
        flops=2 * mp * (2 * d_in * hp + hp * np_),
        transcendentals=mp * hp,  # sigmoid
        bytes_accessed=(mp * d_in + mp * np_) * xbytes
        + grid[0] * (packed.w13.size + packed.w2t.size) * wbytes,
    )

    out2d = pl.pallas_call(
        _swiglu_mlp_kernel,
        out_shape=jax.ShapeDtypeStruct((mp, np_), x.dtype),
        grid_spec=pltpu.PrefetchScalarGridSpec(
            num_scalar_prefetch=0,
            grid=grid,
            in_specs=[
                pl.BlockSpec((tm, d_in), lambda i, j, h: (i, 0)),
                pl.BlockSpec((None, d_in, 2 * th), lambda i, j, h: (h, 0, 0)),
                pl.BlockSpec((th, tn), lambda i, j, h: (h, j)),
            ],
            out_specs=pl.BlockSpec((tm, tn), lambda i, j, h: (i, j)),
            scratch_shapes=[pltpu.VMEM((tm, tn), jnp.float32)],
        ),
        compiler_params=pltpu.CompilerParams(
            dimension_semantics=("parallel", "parallel", "arbitrary")),
        cost_estimate=cost,
    )(x2d, packed.w13, packed.w2t)

    return out2d[:m, :packed.d_model].reshape(b, s, packed.d_model)


def _reference(x, w1, w2, w3):
    """Pure-JAX reference mirroring the PyTorch forward."""
    h1 = jnp.einsum("bsd,hd->bsh", x, w1)
    h3 = jnp.einsum("bsd,hd->bsh", x, w3)
    h = jax.nn.silu(h1) * h3
    return jnp.einsum("bsh,oh->bso", h, w2)


if __name__ == "__main__":
    # Small synthetic config that still exercises padding and every grid axis:
    #   input_dim=192, hidden//2=320 (-> padded to 512, 2 H tiles),
    #   d_model=256 (1 N tile), M = 2*144 = 288 tokens (-> padded to 512, 2 M tiles).
    B, S, D_in = 2, 144, 192
    half_hidden = 320
    d_model = 256
    init_range = 0.02

    key = jax.random.PRNGKey(0)
    kx, k1, k2, k3 = jax.random.split(key, 4)

    x = jax.random.normal(kx, (B, S, D_in), dtype=jnp.float32)
    # nn.Linear weights are (out_features, in_features); reset_parameters uses
    # normal(std=initializer_range).
    w1 = init_range * jax.random.normal(k1, (half_hidden, D_in), dtype=jnp.float32)
    w2 = init_range * jax.random.normal(k2, (d_model, half_hidden), dtype=jnp.float32)
    w3 = init_range * jax.random.normal(k3, (half_hidden, D_in), dtype=jnp.float32)

    packed = pack_projector_weights(w1, w2, w3, tile_h=256, tile_n=256)  # once, off hot path
    out = image_projector_mlp(x, packed, tile_m=256)
    out = jax.block_until_ready(out)

    ref = _reference(x, w1, w2, w3)
    assert out.shape == (B, S, d_model), out.shape
    max_err = float(jnp.max(jnp.abs(out - ref)))
    assert jnp.allclose(out, ref, atol=2e-3, rtol=2e-2), max_err

    print("KERNEL_OK")
</pallas_src>

<mosaic_0001>
module attributes {stable_mosaic.version = 11 : i64} {
  func.func @_swiglu_mlp_kernel(%arg0: i32, %arg1: i32, %arg2: i32, %arg3: memref<256x192xf32, #tpu.memory_space<vmem>>, %arg4: memref<1x192x512xf32, #tpu.memory_space<vmem>>, %arg5: memref<256x256xf32, #tpu.memory_space<vmem>>, %arg6: memref<256x256xf32, #tpu.memory_space<vmem>>, %arg7: memref<256x256xf32, #tpu.memory_space<vmem>>) attributes {dimension_semantics = [#tpu.dimension_semantics<parallel>, #tpu.dimension_semantics<parallel>, #tpu.dimension_semantics<arbitrary>], iteration_bounds = array<i64: 2, 1, 2>, scalar_prefetch = 0 : i64, scratch_operands = 1 : i64, tpu.core_type = #tpu.core_type<tc>, window_params = [{transform_indices = @transform_0, window_bounds = array<i64: 256, 192>}, {transform_indices = @transform_1, window_bounds = array<i64: 1, 192, 512>}, {transform_indices = @transform_2, window_bounds = array<i64: 256, 256>}, {transform_indices = @transform_3, window_bounds = array<i64: 256, 256>}]} {
    %c0_i32 = arith.constant 0 : i32
    %0 = arith.cmpi eq, %arg2, %c0_i32 : i32
    %1 = arith.extui %0 : i1 to i32
    %c0_i32_0 = arith.constant 0 : i32
    %2 = arith.cmpi ne, %1, %c0_i32_0 : i32
    scf.if %2 {
      %cst_14 = arith.constant 0.000000e+00 : f32
      %24 = vector.broadcast %cst_14 : f32 to vector<256x256xf32>
      %c0_15 = arith.constant 0 : index
      %c0_16 = arith.constant 0 : index
      %25 = vector.load %arg7[%c0_15, %c0_16] : memref<256x256xf32, #tpu.memory_space<vmem>>, vector<256x256xf32>
      tpu.vector_store %arg7[%c0_15, %c0_16], %24 {strides = array<i32>} : memref<256x256xf32, #tpu.memory_space<vmem>>, vector<256x256xf32>,
    } else {
    }
    %c0 = arith.constant 0 : index
    %c0_1 = arith.constant 0 : index
    %3 = vector.load %arg3[%c0, %c0_1] : memref<256x192xf32, #tpu.memory_space<vmem>>, vector<256x192xf32>
    %c0_2 = arith.constant 0 : index
    %c0_3 = arith.constant 0 : index
    %c0_4 = arith.constant 0 : index
    %4 = vector.load %arg4[%c0_2, %c0_3, %c0_4] : memref<1x192x512xf32, #tpu.memory_space<vmem>>, vector<1x192x512xf32>
    %5 = vector.shape_cast %4 : vector<1x192x512xf32> to vector<192x512xf32>
    %cst = arith.constant dense<0.000000e+00> : vector<256x512xf32>
    %6 = tpu.matmul %3, %5, %cst {dimension_numbers = #tpu.dot_dimension_numbers<[1], [0], [0], [1], [0, 0, 1, 1], [], []>} : vector<256x192xf32>, vector<192x512xf32>, vector<256x512xf32> -> vector<256x512xf32>
    %7 = vector.extract_strided_slice %6 {offsets = [0, 0], sizes = [256, 256], strides = [1, 1]} : vector<256x512xf32> to vector<256x256xf32>
    %8 = vector.extract_strided_slice %6 {offsets = [0, 256], sizes = [256, 256], strides = [1, 1]} : vector<256x512xf32> to vector<256x256xf32>
    %9 = arith.negf %7 : vector<256x256xf32>
    %10 = math.exp %9 : vector<256x256xf32>
    %cst_5 = arith.constant 1.000000e+00 : f32
    %11 = vector.broadcast %cst_5 : f32 to vector<256x256xf32>
    %12 = arith.addf %11, %10 : vector<256x256xf32>
    %13 = arith.divf %11, %12 : vector<256x256xf32>
    %14 = arith.mulf %7, %13 : vector<256x256xf32>
    %15 = arith.mulf %14, %8 : vector<256x256xf32>
    %c0_6 = arith.constant 0 : index
    %c0_7 = arith.constant 0 : index
    %16 = vector.load %arg7[%c0_6, %c0_7] : memref<256x256xf32, #tpu.memory_space<vmem>>, vector<256x256xf32>
    %c0_8 = arith.constant 0 : index
    %c0_9 = arith.constant 0 : index
    %17 = vector.load %arg5[%c0_8, %c0_9] : memref<256x256xf32, #tpu.memory_space<vmem>>, vector<256x256xf32>
    %cst_10 = arith.constant dense<0.000000e+00> : vector<256x256xf32>
    %18 = tpu.matmul %15, %17, %cst_10 {dimension_numbers = #tpu.dot_dimension_numbers<[1], [0], [0], [1], [0, 0, 1, 1], [], []>} : vector<256x256xf32>, vector<256x256xf32>, vector<256x256xf32> -> vector<256x256xf32>
    %19 = arith.addf %16, %18 : vector<256x256xf32>
    %c0_11 = arith.constant 0 : index
    %c0_12 = arith.constant 0 : index
    %20 = vector.load %arg7[%c0_11, %c0_12] : memref<256x256xf32, #tpu.memory_space<vmem>>, vector<256x256xf32>
    tpu.vector_store %arg7[%c0_11, %c0_12], %19 {strides = array<i32>} : memref<256x256xf32, #tpu.memory_space<vmem>>, vector<256x256xf32>,
    %c1_i32 = arith.constant 1 : i32
    %21 = arith.cmpi eq, %arg2, %c1_i32 : i32
    %22 = arith.extui %21 : i1 to i32
    %c0_i32_13 = arith.constant 0 : i32
    %23 = arith.cmpi ne, %22, %c0_i32_13 : i32
    scf.if %23 {
      %c0_14 = arith.constant 0 : index
      %c0_15 = arith.constant 0 : index
      %24 = vector.load %arg7[%c0_14, %c0_15] : memref<256x256xf32, #tpu.memory_space<vmem>>, vector<256x256xf32>
      %c0_16 = arith.constant 0 : index
      %c0_17 = arith.constant 0 : index
      %25 = vector.load %arg6[%c0_16, %c0_17] : memref<256x256xf32, #tpu.memory_space<vmem>>, vector<256x256xf32>
      tpu.vector_store %arg6[%c0_16, %c0_17], %24 {strides = array<i32>} : memref<256x256xf32, #tpu.memory_space<vmem>>, vector<256x256xf32>,
    } else {
    }
    return
  }
  func.func @transform_0(%arg0: i32, %arg1: i32, %arg2: i32) -> (i32, i32) {
    %c0_i32 = arith.constant 0 : i32
    %c0_i32_0 = arith.constant 0 : i32
    return %arg0, %c0_i32 : i32, i32
  }
  func.func @transform_1(%arg0: i32, %arg1: i32, %arg2: i32) -> (i32, i32, i32) {
    %c0_i32 = arith.constant 0 : i32
    %c0_i32_0 = arith.constant 0 : i32
    %c0_i32_1 = arith.constant 0 : i32
    return %arg2, %c0_i32, %c0_i32_0 : i32, i32, i32
  }
  func.func @transform_2(%arg0: i32, %arg1: i32, %arg2: i32) -> (i32, i32) {
    %c0_i32 = arith.constant 0 : i32
    return %arg2, %arg1 : i32, i32
  }
  func.func @transform_3(%arg0: i32, %arg1: i32, %arg2: i32) -> (i32, i32) {
    %c0_i32 = arith.constant 0 : i32
    return %arg0, %arg1 : i32, i32
  }
}

</mosaic_0001>

<bundles_post_ra>
// kernel: tpu_custom_call.1
= control target key start
LH: loop header
LB: loop body
LE: loop exit
PB: predicated region body
PF: predicated region fallthrough
CT: control target
= control target key end

     0   :  { %s4585_s0 = inlined_call_operand.vmem [shape: f32[512,192], index: 0, kind: input, shape index: {}]   ;;  %s4586_s1 = inlined_call_operand.vmem [shape: f32[2,192,512], index: 1, kind: input, shape index: {}]   ;;  %s4587_s2 = inlined_call_operand.hbm [shape: f32[512,256], index: 2, kind: input, shape index: {}]   ;;  %s4588_s3 = inlined_call_operand.hbm [shape: f32[512,256], index: 3, kind: output, shape index: {}]  }
   0x1   :  { %4616 = sst [smem:[#allocation35_spill]] %s4587_s2 }
   0x2   :  { %8 = vsyncpa [#allocation4], 0 }
   0x3   :  { %10 = vsyncpa [#allocation4 + $0x1], 0 }
   0x4   :  { %11 = vsyncpa [#allocation5], 0 }
   0x5   :  { %13 = vsyncpa [#allocation5 + $0x1], 0  ;;  %s3279_s12 = smov 0   ;;  %s3281_s13 = smov 0  }
   0x6   :  { %s3283_s14 = smov 0   ;;  %s3285_s15 = smov 0  }
   0x7   :  { %s3287_s16 = smov 0   ;;  %s3289_s17 = smov 0  }
   0x8   :  { %s3291_s18 = smov 0   ;;  %s3293_s19 = smov 0  }
   0x9   :  { %s3295_s20 = smov 0   ;;  %s3297_s21 = smov 0  }
   0xa   :  { %s3299_s22 = smov 0  }
   0xb LB: > { %s2394_s23 = sadd.s32 4294967295, %s3250_s22   ;;  %s2395_s24 = sadd.s32 4294967294, %s3250_s22   ;;  %s3250_s22 = sphi %s3299_s22, %s19_s22   ;;  %s3246_s21 = sphi %s3297_s21, %s4687_s21   ;;  %s3242_s20 = sphi %s3295_s20, %s4686_s20   ;;  %s3238_s19 = sphi %s3293_s19, %s4685_s19   ;;  %s3234_s18 = sphi %s3291_s18, %s4684_s18   ;;  %s3230_s17 = sphi %s3289_s17, %s4683_s17   ;;  %s3226_s16 = sphi %s3287_s16, %s4682_s16   ;;  %s3222_s15 = sphi %s3285_s15, %s4681_s15   ;;  %s3218_s14 = sphi %s3283_s14, %s4680_s14   ;;  %s3214_s13 = sphi %s3281_s13, %s4679_s13   ;;  %s3210_s12 = sphi %s3279_s12, %s4678_s12  }
   0xc   : > { %s31_s25 = sadd.s32 1, %s3242_s20  ;;  %s38_s26 = sadd.s32 1, %s3246_s21 }
   0xd   : > { %p32_p0 = scmp.ge.s32.totalorder %s31_s25, 2  ;;  %s99_s27 = sadd.s32 1, %s3230_s17 }
   0xe   : > { %p106_p1 = scmp.ne.s32.totalorder %s3230_s17, %s3226_s16  ;;  %p107_p2 = scmp.eq.s32.totalorder %s3250_s22, 0 }
   0xf   : > { %s4689_s25 = smov (%p32_p0, %s31_s25), 0  ;;  %s4691_s26 = smov (!%p32_p0, %s38_s26), %s3246_s21 }
  0x10   : > { %4617 = sst [smem:[#allocation9_spill]] %s4689_s25  ;;  %s94_s28 = ssub.s32 %s3242_s20, %s4689_s25 }
  0x11   : > { %p3345_p3 = por %p107_p2, %p106_p1  ;;  %p40_p4 = scmp.ge.s32.totalorder %s4691_s26, 2 }
  0x12   : > { %p97_p5 = scmp.eq.s32.totalorder %s94_s28, 0  ;;  %p112_p6 = scmp.ne.s32.totalorder %s3226_s16, %s3222_s15 }
  0x13   : > { %p113_p7 = scmp.eq.s32.totalorder %s2394_s23, 0  ;;  %s4693_s26 = smov (%p40_p4, %s4691_s26), 0 }
  0x14   : > { %4619 = sst [smem:[#allocation10_spill]] %s4693_s26  ;;  %s122_s5 = ssub.s32 %s3246_s21, %s4693_s26 }
  0x15   : > { %s3353_s30 = scalar_select %p97_p5, %s3230_s17, %s99_s27  }
  0x16   : > { %p3355_p8 = por %p113_p7, %p112_p6  ;;  %p125_p9 = scmp.eq.s32.totalorder %s122_s5, 0 }
  0x17   : > { %s127_s6 = sadd.s32 1, %s3218_s14  ;;  %p137_p10 = scmp.ne.s32.totalorder %s3218_s14, %s3214_s13 }
  0x18   : > { %p138_p11 = scmp.eq.s32.totalorder %s2394_s23, 3  ;;  %p143_p13 = scmp.ne.s32.totalorder %s3214_s13, %s3210_s12 }
  0x19   : > { %s3365_s7 = scalar_select %p125_p9, %s3218_s14, %s127_s6  }
  0x1a   : > { %p3367_p12 = por %p138_p11, %p137_p10  ;;  %p144_p0 = scmp.eq.s32.totalorder %s2395_s24, 3 }
  0x1b   : > { %p2747_p1 = scmp.lt.s32.totalorder %s3250_s22, 4  ;;  %s182_s9 = sand.u32 1, %s3230_s17  }
  0x1c   : > { %s4621_s8 = scalar_select %p3367_p12, 1, 0 }
  0x1d   : > { %p3375_p2 = por %p144_p0, %p143_p13  ;;  %s2398_s11 = sshll.u32 %s182_s9, 9 }
  0x1e   : > { %s2546_s15 = sshll.u32 %s3242_s20, 13  ;;  %s4623_s2 = sld [smem:[#allocation35_spill]] }
  0x1f   : > { %s4622_s10 = scalar_select %p3375_p2, 1, 0 }
  0x20   : > { %s186_s5 = scalar_lea.vmem [#allocation3], %s2398_s11  ;;  %p3387_p4 = pnand %p2747_p1, %p3345_p3 }
  0x21   : > { %s196_s6 = sshll.u32 %s186_s5, 4  ;;  %s3393_s26 = scalar_lea.sflag [#allocation4], %s182_s9  ;;  %s3391_s6 = int_to_ptr.vmem [resolvable:$true] %s196_s6 }
  0x22   : > { %p3100_p6 = pneg %p3387_p4 }
  0x24   : > { %s3383_s23 = scalar_lea.hbm %s4623_s2, %s2546_s15  ;;  %s3103_s15 = scalar_lea.hbm %s4623_s2, 16384 }
  0x25   : > { %s3098_s27 = scalar_lea.hbm %s3383_s23, 8192  ;;  %p3104_p3 = scmp.lt.u32.totalorder %s3383_s23, %s4623_s2 }
  0x26   : > { %p3099_p5 = scmp.ne.s32.totalorder %s3383_s23, %s3098_s27  ;;  %p3105_p10 = scmp.lt.u32.totalorder %s3103_s15, %s3098_s27 }
  0x27   : > { %p3107_p13 = scmp.lt.u32.totalorder %s3098_s27, %s3383_s23 }
  0x28   : > { %p3101_p7 = pnand %p3100_p6, %p3099_p5  ;;  %p3106_p11 = por %p3105_p10, %p3104_p3 }
  0x2a   : > { %p3102_p9 = pneg %p3101_p7  ;;  %p3108_p0 = por %p3107_p13, %p3106_p11 }
  0x2c   : > { %p3109_p1 = pnand %p3108_p0, %p3102_p9 }
  0x2e   : > { %3112 = shalt.err (!%p3109_p1)
}
  0x2f   : > { %s3113_s9 = scalar_lea.vmem %s3391_s6, 8192  ;;  %s3252_s11 = smov [#allocation3]  }
  0x30   : > { %p3114_p5 = scmp.ne.s32.totalorder %s3391_s6, %s3113_s9  ;;  %s3118_s29 = sshll.u32 %s3252_s11, 4  ;;  %s3119_s29 = int_to_ptr.vmem [resolvable:$false] %s3118_s29 }
  0x31   : > { %s3120_s28 = scalar_lea.vmem %s3119_s29, 16384  ;;  %p3121_p12 = scmp.lt.s32.totalorder %s3391_s6, %s3119_s29 }
  0x32   : > { %p3116_p7 = pnand %p3114_p5, %p3100_p6  ;;  %p3122_p3 = scmp.lt.s32.totalorder %s3120_s28, %s3113_s9 }
  0x34   : > { %p3117_p2 = pneg %p3116_p7  ;;  %p3123_p10 = por %p3122_p3, %p3121_p12 }
  0x36   : > { %p3124_p11 = pnand %p3123_p10, %p3117_p2 }
  0x38   : > { %3127 = shalt.err (!%p3124_p11)
}
  0x39   : > { %s3253_s27 = smov 256   ;;  %s3254_s15 = smov 16  }
  0x3a   : > { %2742 = dma.hbm_to_vmem [thread:$0]  (!%p3387_p4), %s3383_s23, 8192, %s3391_s6, %s3393_s26, %s3253_s27, %s3253_s27, %s3254_s15  }
  0x3b   : > { %p2402_p6 = scmp.ge.s32.totalorder %s3250_s22, 1  ;;  %p204_p9 = scmp.lt.s32.totalorder %s3250_s22, 5 }
  0x3d   : > { %p205_p13 = pnand %p2402_p6, %p204_p9 }
  0x3f   : > { %208 = sbr.rel (%p205_p13) target bundleno = 838 (0x346), region = 32 }
  0x46   : > { %s210_s5 = sand.u32 1, %s3226_s16  }
  0x47   : > { %s2403_s9 = sshll.u32 %s210_s5, 9  ;;  %s211_s11 = scalar_lea.sflag [#allocation4], %s210_s5 }
  0x48   : > { %s3424_s29 = scalar_lea.vmem [#allocation3], %s2403_s9 }
  0x49   : > { %3201 = dma.done.wait (%p3355_p8), %s211_s11, 8192  }
  0x4a   : > { %3203 = vsyncadd (%p3355_p8), %s211_s11, 4294959104  ;;  %s245_s26 = sand.u32 1, %s3214_s13   ;;  %s2405_s23 = sshll.u32 %s3238_s19, 5 }
  0x4b   : > { %s2404_s6 = sshll.u32 %s245_s26, 9  ;;  %p249_p12 = scmp.lt.s32.totalorder %s2405_s23, 63 }
  0x4c   : > { %p255_p2 = scmp.lt.s32.totalorder %s3234_s18, 1  ;;  %s3446_s25 = scalar_lea.vmem [#allocation6], %s2404_s6 }
  0x4d   : > { %s4695_s23 = smov (!%p249_p12, %s2405_s23), 63  ;;  %p2409_p8 = scmp.ne.s32.totalorder %s3234_s18, 0 }
  0x4e   : > { %s256_s24 = scalar_select %p255_p2, %s3234_s18, 1 }
  0x4f   : > { %s2547_s28 = sshll.u32 %s4695_s23, 4  ;;  %267 = sbr.rel (%p2409_p8) target bundleno = 112 (0x70), region = 40  ;;  %v3255_v0 = vmov (!%p2409_p8), 0.0  }
  0x50   : > { %s3439_s5 = scalar_lea.vmem %s4585_s0, %s2547_s28  ;;  %s2734_s4 = smul.u32 768, %s256_s24  ;;  %268 = vst [vmem:[#allocation2] sm:$0xff] (!%p2409_p8), %v3255_v0  ;;  %269 = vst [vmem:[#allocation2 + $0x8] sm:$0xff] (!%p2409_p8), %v3255_v0 }
  0x51   : > { %270 = vst [vmem:[#allocation2 + $0x10] sm:$0xff] (!%p2409_p8), %v3255_v0  ;;  %271 = vst [vmem:[#allocation2 + $0x18] sm:$0xff] (!%p2409_p8), %v3255_v0 }
  0x52   : > { %s3444_s2 = scalar_lea.vmem %s4586_s1, %s2734_s4  ;;  %272 = vst [vmem:[#allocation2 + $0x20] sm:$0xff] (!%p2409_p8), %v3255_v0  ;;  %273 = vst [vmem:[#allocation2 + $0x28] sm:$0xff] (!%p2409_p8), %v3255_v0 }
  0x53   : > { %274 = vst [vmem:[#allocation2 + $0x30] sm:$0xff] (!%p2409_p8), %v3255_v0  ;;  %275 = vst [vmem:[#allocation2 + $0x38] sm:$0xff] (!%p2409_p8), %v3255_v0 }
  0x54   : > { %276 = vst [vmem:[#allocation2 + $0x40] sm:$0xff] (!%p2409_p8), %v3255_v0  ;;  %277 = vst [vmem:[#allocation2 + $0x48] sm:$0xff] (!%p2409_p8), %v3255_v0 }
  0x55   : > { %278 = vst [vmem:[#allocation2 + $0x50] sm:$0xff] (!%p2409_p8), %v3255_v0  ;;  %279 = vst [vmem:[#allocation2 + $0x58] sm:$0xff] (!%p2409_p8), %v3255_v0 }
  0x56   : > { %280 = vst [vmem:[#allocation2 + $0x60] sm:$0xff] %v3255_v0  ;;  %281 = vst [vmem:[#allocation2 + $0x68] sm:$0xff] %v3255_v0 }
  0x57   : > { %282 = vst [vmem:[#allocation2 + $0x70] sm:$0xff] %v3255_v0  ;;  %283 = vst [vmem:[#allocation2 + $0x78] sm:$0xff] %v3255_v0 }
  0x58   : > { %284 = vst [vmem:[#allocation2 + $0x80] sm:$0xff] %v3255_v0  ;;  %285 = vst [vmem:[#allocation2 + $0x88] sm:$0xff] %v3255_v0 }
  0x59   : > { %286 = vst [vmem:[#allocation2 + $0x90] sm:$0xff] %v3255_v0  ;;  %287 = vst [vmem:[#allocation2 + $0x98] sm:$0xff] %v3255_v0 }
  0x5a   : > { %288 = vst [vmem:[#allocation2 + $0xa0] sm:$0xff] %v3255_v0  ;;  %289 = vst [vmem:[#allocation2 + $0xa8] sm:$0xff] %v3255_v0 }
  0x5b   : > { %290 = vst [vmem:[#allocation2 + $0xb0] sm:$0xff] %v3255_v0  ;;  %291 = vst [vmem:[#allocation2 + $0xb8] sm:$0xff] %v3255_v0 }
  0x5c   : > { %292 = vst [vmem:[#allocation2 + $0xc0] sm:$0xff] %v3255_v0  ;;  %293 = vst [vmem:[#allocation2 + $0xc8] sm:$0xff] %v3255_v0 }
  0x5d   : > { %294 = vst [vmem:[#allocation2 + $0xd0] sm:$0xff] %v3255_v0  ;;  %295 = vst [vmem:[#allocation2 + $0xd8] sm:$0xff] %v3255_v0 }
  0x5e   : > { %296 = vst [vmem:[#allocation2 + $0xe0] sm:$0xff] %v3255_v0  ;;  %297 = vst [vmem:[#allocation2 + $0xe8] sm:$0xff] %v3255_v0 }
  0x5f   : > { %298 = vst [vmem:[#allocation2 + $0xf0] sm:$0xff] %v3255_v0  ;;  %299 = vst [vmem:[#allocation2 + $0xf8] sm:$0xff] %v3255_v0 }
  0x60   : > { %300 = vst [vmem:[#allocation2 + $0x100] sm:$0xff] %v3255_v0  ;;  %301 = vst [vmem:[#allocation2 + $0x108] sm:$0xff] %v3255_v0 }
  0x61   : > { %302 = vst [vmem:[#allocation2 + $0x110] sm:$0xff] %v3255_v0  ;;  %303 = vst [vmem:[#allocation2 + $0x118] sm:$0xff] %v3255_v0 }
  0x62   : > { %304 = vst [vmem:[#allocation2 + $0x120] sm:$0xff] %v3255_v0  ;;  %305 = vst [vmem:[#allocation2 + $0x128] sm:$0xff] %v3255_v0 }
  0x63   : > { %306 = vst [vmem:[#allocation2 + $0x130] sm:$0xff] %v3255_v0  ;;  %307 = vst [vmem:[#allocation2 + $0x138] sm:$0xff] %v3255_v0 }
  0x64   : > { %308 = vst [vmem:[#allocation2 + $0x140] sm:$0xff] %v3255_v0  ;;  %309 = vst [vmem:[#allocation2 + $0x148] sm:$0xff] %v3255_v0 }
  0x65   : > { %310 = vst [vmem:[#allocation2 + $0x150] sm:$0xff] %v3255_v0  ;;  %311 = vst [vmem:[#allocation2 + $0x158] sm:$0xff] %v3255_v0 }
  0x66   : > { %312 = vst [vmem:[#allocation2 + $0x160] sm:$0xff] %v3255_v0  ;;  %313 = vst [vmem:[#allocation2 + $0x168] sm:$0xff] %v3255_v0 }
  0x67   : > { %314 = vst [vmem:[#allocation2 + $0x170] sm:$0xff] %v3255_v0  ;;  %315 = vst [vmem:[#allocation2 + $0x178] sm:$0xff] %v3255_v0 }
  0x68   : > { %316 = vst [vmem:[#allocation2 + $0x180] sm:$0xff] %v3255_v0  ;;  %317 = vst [vmem:[#allocation2 + $0x188] sm:$0xff] %v3255_v0 }
  0x69   : > { %318 = vst [vmem:[#allocation2 + $0x190] sm:$0xff] %v3255_v0  ;;  %319 = vst [vmem:[#allocation2 + $0x198] sm:$0xff] %v3255_v0 }
  0x6a   : > { %320 = vst [vmem:[#allocation2 + $0x1a0] sm:$0xff] %v3255_v0  ;;  %321 = vst [vmem:[#allocation2 + $0x1a8] sm:$0xff] %v3255_v0 }
  0x6b   : > { %322 = vst [vmem:[#allocation2 + $0x1b0] sm:$0xff] %v3255_v0  ;;  %323 = vst [vmem:[#allocation2 + $0x1b8] sm:$0xff] %v3255_v0 }
  0x6c   : > { %324 = vst [vmem:[#allocation2 + $0x1c0] sm:$0xff] %v3255_v0  ;;  %325 = vst [vmem:[#allocation2 + $0x1c8] sm:$0xff] %v3255_v0 }
  0x6d   : > { %326 = vst [vmem:[#allocation2 + $0x1d0] sm:$0xff] %v3255_v0  ;;  %327 = vst [vmem:[#allocation2 + $0x1d8] sm:$0xff] %v3255_v0 }
  0x6e   : > { %328 = vst [vmem:[#allocation2 + $0x1e0] sm:$0xff] %v3255_v0  ;;  %329 = vst [vmem:[#allocation2 + $0x1e8] sm:$0xff] %v3255_v0 }
  0x6f   : > { %330 = vst [vmem:[#allocation2 + $0x1f0] sm:$0xff] %v3255_v0  ;;  %331 = vst [vmem:[#allocation2 + $0x1f8] sm:$0xff] %v3255_v0 }
  0x70 PF: > { %v397_v1 = vld [vmem:[%s3444_s2 + $0x8] sm:$0xff]  ;;  %v396_v3 = vld [vmem:[%s3444_s2] sm:$0xff]  ;;  %vm492_vm0 = vcmask 523264   ;;  %p2538_p4 = scmp.ne.s32.totalorder %s3234_s18, 1 }
  0x71   : > { %v401_v2 = vld [vmem:[%s3444_s2 + $0x28] sm:$0xff]  ;;  %v400_v5 = vld [vmem:[%s3444_s2 + $0x20] sm:$0xff] }
  0x72   : > { %v2550_v4 = vpack.c.bf16 %v401_v2, %v397_v1  ;;  %v405_v6 = vld [vmem:[%s3444_s2 + $0x48] sm:$0xff]  ;;  %v2552_v8 = vpack.c.bf16 %v400_v5, %v396_v3  ;;  %v404_v10 = vld [vmem:[%s3444_s2 + $0x40] sm:$0xff] }
  0x73   : > { %v409_v7 = vld [vmem:[%s3444_s2 + $0x68] sm:$0xff]  ;;  %v408_v11 = vld [vmem:[%s3444_s2 + $0x60] sm:$0xff] }
  0x74   : > { %v2554_v9 = vpack.c.bf16 %v409_v7, %v405_v6  ;;  %v413_v12 = vld [vmem:[%s3444_s2 + $0x88] sm:$0xff]  ;;  %2710 = vmatprep.subr.bf16.mxu1 %v2550_v4  ;;  %2551 = vmatprep.subr.bf16.mxu0 %v2550_v4  ;;  %v2556_v14 = vpack.c.bf16 %v408_v11, %v404_v10  ;;  %v412_v16 = vld [vmem:[%s3444_s2 + $0x80] sm:$0xff]  ;;  %v399_v10 = vld [vmem:[%s3444_s2 + $0x18] sm:$0xff] }
  0x75   : > { %v417_v13 = vld [vmem:[%s3444_s2 + $0xa8] sm:$0xff]  ;;  %2722 = vmatpush1.bf16.msra.mxu1 %v2552_v8  ;;  %2553 = vmatpush1.bf16.msra.mxu0 %v2552_v8  ;;  %v416_v17 = vld [vmem:[%s3444_s2 + $0xa0] sm:$0xff]  ;;  %v403_v11 = vld [vmem:[%s3444_s2 + $0x38] sm:$0xff] }
  0x76   : > { %2711 = vmatprep.subr.bf16.mxu1 %v2554_v9  ;;  %v2558_v15 = vpack.c.bf16 %v417_v13, %v413_v12  ;;  %2555 = vmatprep.subr.bf16.mxu0 %v2554_v9  ;;  %v421_v18 = vld [vmem:[%s3444_s2 + $0xc8] sm:$0xff]  ;;  %v2560_v20 = vpack.c.bf16 %v416_v17, %v412_v16  ;;  %v420_v22 = vld [vmem:[%s3444_s2 + $0xc0] sm:$0xff]  ;;  %v2598_v13 = vpack.c.bf16 %v403_v11, %v399_v10  ;;  %v407_v16 = vld [vmem:[%s3444_s2 + $0x58] sm:$0xff] }
  0x77   : > { %v425_v19 = vld [vmem:[%s3444_s2 + $0xe8] sm:$0xff]  ;;  %v424_v23 = vld [vmem:[%s3444_s2 + $0xe0] sm:$0xff]  ;;  %v411_v17 = vld [vmem:[%s3444_s2 + $0x78] sm:$0xff] }
  0x78   : > { %v2562_v21 = vpack.c.bf16 %v425_v19, %v421_v18  ;;  %v429_v24 = vld [vmem:[%s3444_s2 + $0x108] sm:$0xff]  ;;  %v2564_v26 = vpack.c.bf16 %v424_v23, %v420_v22  ;;  %v428_v28 = vld [vmem:[%s3444_s2 + $0x100] sm:$0xff]  ;;  %v2602_v22 = vpack.c.bf16 %v411_v17, %v407_v16  ;;  %v406_v23 = vld [vmem:[%s3444_s2 + $0x50] sm:$0xff] }
  0x79   : > { %2723 = vmatpush1.bf16.msra.mxu1 %v2556_v14  ;;  %2557 = vmatpush1.bf16.msra.mxu0 %v2556_v14  ;;  %v433_v25 = vld [vmem:[%s3444_s2 + $0x128] sm:$0xff]  ;;  %v432_v29 = vld [vmem:[%s3444_s2 + $0x120] sm:$0xff]  ;;  %v398_v14 = vld [vmem:[%s3444_s2 + $0x10] sm:$0xff] }
  0x7a   : > { %2712 = vmatprep.subr.bf16.mxu1 %v2558_v15  ;;  %2559 = vmatprep.subr.bf16.mxu0 %v2558_v15  ;;  %v2566_v27 = vpack.c.bf16 %v433_v25, %v429_v24  ;;  %v437_v30 = vld [vmem:[%s3444_s2 + $0x148] sm:$0xff]  ;;  %v2568_v32 = vpack.c.bf16 %v432_v29, %v428_v28  ;;  %v436_v35 = vld [vmem:[%s3444_s2 + $0x140] sm:$0xff]  ;;  %v402_v15 = vld [vmem:[%s3444_s2 + $0x30] sm:$0xff] }
  0x7b   : > { %v441_v31 = vld [vmem:[%s3444_s2 + $0x168] sm:$0xff]  ;;  %v440_v36 = vld [vmem:[%s3444_s2 + $0x160] sm:$0xff]  ;;  %v2600_v19 = vpack.c.bf16 %v402_v15, %v398_v14  ;;  %v410_v24 = vld [vmem:[%s3444_s2 + $0x70] sm:$0xff] }
  0x7c   : > { %v3536_v33 = vld [vmem:[%s3439_s5 + $0x108] sm:$0xff]  ;;  %v2570_v34 = vpack.c.bf16 %v441_v31, %v437_v30  ;;  %v2572_v39 = vpack.c.bf16 %v440_v36, %v436_v35  ;;  %v444_v42 = vld [vmem:[%s3444_s2 + $0x180] sm:$0xff]  ;;  %v415_v25 = vld [vmem:[%s3444_s2 + $0x98] sm:$0xff]  ;;  %v2604_v29 = vpack.c.bf16 %v410_v24, %v406_v23 }
  0x7d   : > { %2724 = vmatpush1.bf16.msra.mxu1 %v2560_v20  ;;  %2561 = vmatpush1.bf16.msra.mxu0 %v2560_v20  ;;  %v445_v37 = vld [vmem:[%s3444_s2 + $0x188] sm:$0xff]  ;;  %v448_v43 = vld [vmem:[%s3444_s2 + $0x1a0] sm:$0xff]  ;;  %v3598_v28 = vld [vmem:[%s3439_s5 + $0x110] sm:$0xff] }
  0x7e   : > { %2713 = vmatprep.subr.bf16.mxu1 %v2562_v21  ;;  %2563 = vmatprep.subr.bf16.mxu0 %v2562_v21  ;;  %v449_v38 = vld [vmem:[%s3444_s2 + $0x1a8] sm:$0xff]  ;;  %v2576_v46 = vpack.c.bf16 %v448_v43, %v444_v42  ;;  %v452_v48 = vld [vmem:[%s3444_s2 + $0x1c0] sm:$0xff]  ;;  %v3584_v21 = vld [vmem:[%s3439_s5 + $0x118] sm:$0xff] }
  0x7f   : > { %2426 = vmatprep.mubr.msk.f32.mxu1 %vm492_vm0, %v3536_v33  ;;  %v3545_v40 = vld [vmem:[%s3439_s5 + $0x8] sm:$0xff]  ;;  %v2574_v41 = vpack.c.bf16 %v449_v38, %v445_v37  ;;  %v456_v49 = vld [vmem:[%s3444_s2 + $0x1e0] sm:$0xff]  ;;  %v3601_v30 = vld [vmem:[%s3439_s5 + $0x10] sm:$0xff] }
  0x80   : > { %v453_v44 = vld [vmem:[%s3444_s2 + $0x1c8] sm:$0xff]  ;;  %2410 = vmatprep.mubr.msk.f32.mxu0 %vm492_vm0, %v3545_v40  ;;  %v2580_v52 = vpack.c.bf16 %v456_v49, %v452_v48  ;;  %v460_v54 = vld [vmem:[%s3444_s2 + $0x200] sm:$0xff]  ;;  %v418_v35 = vld [vmem:[%s3444_s2 + $0xb0] sm:$0xff] }
  0x81   : > { %2725 = vmatpush1.bf16.msra.mxu1 %v2564_v26  ;;  %2565 = vmatpush1.bf16.msra.mxu0 %v2564_v26  ;;  %v457_v45 = vld [vmem:[%s3444_s2 + $0x1e8] sm:$0xff]  ;;  %v464_v55 = vld [vmem:[%s3444_s2 + $0x220] sm:$0xff]  ;;  %v419_v26 = vld [vmem:[%s3444_s2 + $0xb8] sm:$0xff] }
  0x82   : > { %2714 = vmatprep.subr.bf16.mxu1 %v2566_v27  ;;  %2567 = vmatprep.subr.bf16.mxu0 %v2566_v27  ;;  %v2578_v47 = vpack.c.bf16 %v457_v45, %v453_v44  ;;  %v461_v50 = vld [vmem:[%s3444_s2 + $0x208] sm:$0xff]  ;;  %v2584_v58 = vpack.c.bf16 %v464_v55, %v460_v54  ;;  %v468_v60 = vld [vmem:[%s3444_s2 + $0x240] sm:$0xff]  ;;  %v3591_v27 = vld [vmem:[%s3439_s5 + $0x18] sm:$0xff] }
  0x83   : > { %v465_v51 = vld [vmem:[%s3444_s2 + $0x228] sm:$0xff]  ;;  %v472_v61 = vld [vmem:[%s3444_s2 + $0x260] sm:$0xff]  ;;  %v423_v36 = vld [vmem:[%s3444_s2 + $0xd8] sm:$0xff] }
  0x84   : > { %v2582_v53 = vpack.c.bf16 %v465_v51, %v461_v50  ;;  %v469_v56 = vld [vmem:[%s3444_s2 + $0x248] sm:$0xff]  ;;  %v2588_v0 = vpack.c.bf16 %v472_v61, %v468_v60  ;;  %v476_v2 = vld [vmem:[%s3444_s2 + $0x280] sm:$0xff]  ;;  %v427_v37 = vld [vmem:[%s3444_s2 + $0xf8] sm:$0xff] }
  0x85   : > { %2726 = vmatpush1.bf16.msra.mxu1 %v2568_v32  ;;  %2569 = vmatpush1.bf16.msra.mxu0 %v2568_v32  ;;  %v473_v57 = vld [vmem:[%s3444_s2 + $0x268] sm:$0xff]  ;;  %v480_v3 = vld [vmem:[%s3444_s2 + $0x2a0] sm:$0xff]  ;;  %v2606_v32 = vpack.c.bf16 %v419_v26, %v415_v25  ;;  %v3626_v43 = vld [vmem:[%s3439_s5 + $0x138] sm:$0xff]  ;;  %v2610_v44 = vpack.c.bf16 %v427_v37, %v423_v36 }
  0x86   : > { %2715 = vmatprep.subr.bf16.mxu1 %v2570_v34  ;;  %2571 = vmatprep.subr.bf16.mxu0 %v2570_v34  ;;  %v2586_v59 = vpack.c.bf16 %v473_v57, %v469_v56  ;;  %v477_v62 = vld [vmem:[%s3444_s2 + $0x288] sm:$0xff]  ;;  %v2592_v6 = vpack.c.bf16 %v480_v3, %v476_v2  ;;  %v484_v8 = vld [vmem:[%s3444_s2 + $0x2c0] sm:$0xff]  ;;  %v414_v34 = vld [vmem:[%s3444_s2 + $0x90] sm:$0xff] }
  0x87   : > { %v481_v63 = vld [vmem:[%s3444_s2 + $0x2a8] sm:$0xff]  ;;  %v488_v9 = vld [vmem:[%s3444_s2 + $0x2e0] sm:$0xff]  ;;  %v422_v45 = vld [vmem:[%s3444_s2 + $0xd0] sm:$0xff] }
  0x88   : > { %v2590_v1 = vpack.c.bf16 %v481_v63, %v477_v62  ;;  %v485_v4 = vld [vmem:[%s3444_s2 + $0x2c8] sm:$0xff]  ;;  %v2596_v12 = vpack.c.bf16 %v488_v9, %v484_v8  ;;  %v3578_v18 = vld [vmem:[%s3439_s5 + $0x100] sm:$0xff]  ;;  %v431_v48 = vld [vmem:[%s3444_s2 + $0x118] sm:$0xff] }
  0x89   : > { %2727 = vmatpush1.bf16.msra.mxu1 %v2572_v39  ;;  %2573 = vmatpush1.bf16.msra.mxu0 %v2572_v39  ;;  %v489_v5 = vld [vmem:[%s3444_s2 + $0x2e8] sm:$0xff]  ;;  %v3581_v20 = vld [vmem:[%s3439_s5] sm:$0xff]  ;;  %v435_v49 = vld [vmem:[%s3444_s2 + $0x138] sm:$0xff] }
  0x8a   : > { %2716 = vmatprep.subr.bf16.mxu1 %v2574_v41  ;;  %2575 = vmatprep.subr.bf16.mxu0 %v2574_v41  ;;  %v2594_v7 = vpack.c.bf16 %v489_v5, %v485_v4  ;;  %v3604_v31 = vld [vmem:[%s3439_s5 + $0x128] sm:$0xff]  ;;  %v3620_v39 = vld [vmem:[%s3439_s5 + $0x120] sm:$0xff]  ;;  %v2608_v41 = vpack.c.bf16 %v418_v35, %v414_v34  ;;  %v3642_v50 = vld [vmem:[%s3439_s5 + $0x130] sm:$0xff]  ;;  %v2614_v54 = vpack.c.bf16 %v435_v49, %v431_v48 }
  0x8b   : > { %v3613_v38 = vld [vmem:[%s3439_s5 + $0x28] sm:$0xff]  ;;  %v3623_v42 = vld [vmem:[%s3439_s5 + $0x20] sm:$0xff]  ;;  %v430_v55 = vld [vmem:[%s3444_s2 + $0x110] sm:$0xff] }
  0x8c   : > { %v434_v56 = vld [vmem:[%s3444_s2 + $0x130] sm:$0xff]  ;;  %v3655_v57 = vld [vmem:[%s3439_s5 + $0x48] sm:$0xff]  ;;  %v3664_v60 = vld [vmem:[%s3439_s5 + $0x140] sm:$0xff] }
  0x8d   : > { %2728 = vmatpush1.bf16.msra.mxu1 %v2576_v46  ;;  %2577 = vmatpush1.bf16.msra.mxu0 %v2576_v46  ;;  %v426_v46 = vld [vmem:[%s3444_s2 + $0xf0] sm:$0xff]  ;;  %v2616_v61 = vpack.c.bf16 %v434_v56, %v430_v55  ;;  %v3667_v62 = vld [vmem:[%s3439_s5 + $0x40] sm:$0xff]  ;;  %v3670_v63 = vld [vmem:[%s3439_s5 + $0x158] sm:$0xff] }
  0x8e   : > { %2717 = vmatprep.subr.bf16.mxu1 %v2578_v47  ;;  %2579 = vmatprep.subr.bf16.mxu0 %v2578_v47  ;;  %v3633_v47 = vld [vmem:[%s3439_s5 + $0x38] sm:$0xff]  ;;  %v2612_v51 = vpack.c.bf16 %v426_v46, %v422_v45  ;;  %v442_v2 = vld [vmem:[%s3444_s2 + $0x170] sm:$0xff]  ;;  %v3692_v9 = vld [vmem:[%s3439_s5 + $0x168] sm:$0xff] }
  0x8f   : > { %v3677_v3 = vld [vmem:[%s3439_s5 + $0x58] sm:$0xff]  ;;  %v3689_v8 = vld [vmem:[%s3439_s5 + $0x50] sm:$0xff]  ;;  %v3708_v16 = vld [vmem:[%s3439_s5 + $0x160] sm:$0xff] }
  0x90   : > { %v447_v4 = vld [vmem:[%s3444_s2 + $0x198] sm:$0xff]  ;;  %v446_v11 = vld [vmem:[%s3444_s2 + $0x190] sm:$0xff]  ;;  %v3736_v37 = vld [vmem:[%s3439_s5 + $0x188] sm:$0xff] }
  0x91   : > { %2729 = vmatpush1.bf16.msra.mxu1 %v2580_v52  ;;  %2581 = vmatpush1.bf16.msra.mxu0 %v2580_v52  ;;  %v3645_v52 = vld [vmem:[%s3439_s5 + $0x30] sm:$0xff]  ;;  %v451_v5 = vld [vmem:[%s3444_s2 + $0x1b8] sm:$0xff]  ;;  %v3743_v46 = vld [vmem:[%s3439_s5 + $0x88] sm:$0xff] }
  0x92   : > { %2718 = vmatprep.subr.bf16.mxu1 %v2582_v53  ;;  %2583 = vmatprep.subr.bf16.mxu0 %v2582_v53  ;;  %v3648_v53 = vld [vmem:[%s3439_s5 + $0x148] sm:$0xff]  ;;  %v2622_v10 = vpack.c.bf16 %v451_v5, %v447_v4  ;;  %v455_v14 = vld [vmem:[%s3444_s2 + $0x1d8] sm:$0xff]  ;;  %v454_v24 = vld [vmem:[%s3444_s2 + $0x1d0] sm:$0xff] }
  0x93   : > { %v459_v15 = vld [vmem:[%s3444_s2 + $0x1f8] sm:$0xff]  ;;  %v458_v25 = vld [vmem:[%s3444_s2 + $0x1f0] sm:$0xff] }
  0x94   : > { %v2626_v23 = vpack.c.bf16 %v459_v15, %v455_v14  ;;  %v3721_v26 = vld [vmem:[%s3439_s5 + $0x78] sm:$0xff]  ;;  %v3730_v34 = vld [vmem:[%s3439_s5 + $0x170] sm:$0xff]  ;;  %v2628_v36 = vpack.c.bf16 %v458_v25, %v454_v24  ;;  %v3796_v24 = vld [vmem:[%s3439_s5 + $0x1a0] sm:$0xff] }
  0x95   : > { %2730 = vmatpush1.bf16.msra.mxu1 %v2584_v58  ;;  %2585 = vmatpush1.bf16.msra.mxu0 %v2584_v58  ;;  %v439_v58 = vld [vmem:[%s3444_s2 + $0x158] sm:$0xff]  ;;  %v3733_v35 = vld [vmem:[%s3439_s5 + $0x70] sm:$0xff]  ;;  %v3801_v25 = vld [vmem:[%s3439_s5 + $0xa0] sm:$0xff] }
  0x96   : > { %2719 = vmatprep.subr.bf16.mxu1 %v2586_v59  ;;  %2587 = vmatprep.subr.bf16.mxu0 %v2586_v59  ;;  %v443_v59 = vld [vmem:[%s3444_s2 + $0x178] sm:$0xff]  ;;  %v466_v45 = vld [vmem:[%s3444_s2 + $0x230] sm:$0xff] }
  0x97   : > { %v471_v48 = vld [vmem:[%s3444_s2 + $0x258] sm:$0xff]  ;;  %v3774_v4 = vld [vmem:[%s3439_s5 + $0x190] sm:$0xff] }
  0x98   : > { %v475_v49 = vld [vmem:[%s3444_s2 + $0x278] sm:$0xff]  ;;  %v3777_v5 = vld [vmem:[%s3439_s5 + $0x90] sm:$0xff] }
  0x99   : > { %2731 = vmatpush1.bf16.msra.mxu1 %v2588_v0  ;;  %2589 = vmatpush1.bf16.msra.mxu0 %v2588_v0  ;;  %v2618_v0 = vpack.c.bf16 %v443_v59, %v439_v58  ;;  %v3758_v56 = vld [vmem:[%s3439_s5 + $0x198] sm:$0xff]  ;;  %v2634_v58 = vpack.c.bf16 %v475_v49, %v471_v48  ;;  %v478_v14 = vld [vmem:[%s3444_s2 + $0x290] sm:$0xff] }
  0x9a   : > { %2720 = vmatprep.subr.bf16.mxu1 %v2590_v1  ;;  %2591 = vmatprep.subr.bf16.mxu0 %v2590_v1  ;;  %v438_v1 = vld [vmem:[%s3444_s2 + $0x150] sm:$0xff]  ;;  %v3763_v59 = vld [vmem:[%s3439_s5 + $0x98] sm:$0xff] }
  0x9b   : > { %v482_v15 = vld [vmem:[%s3444_s2 + $0x2b0] sm:$0xff] }
  0x9c   : > { %v3816_v48 = vld [vmem:[%s3439_s5 + $0x1b0] sm:$0xff] }
  0x9d   : > { %2732 = vmatpush1.bf16.msra.mxu1 %v2592_v6  ;;  %2593 = vmatpush1.bf16.msra.mxu0 %v2592_v6  ;;  %v3686_v6 = vld [vmem:[%s3439_s5 + $0x150] sm:$0xff] }
  0x9e   : > { %2721 = vmatprep.subr.bf16.mxu1 %v2594_v7  ;;  %2595 = vmatprep.subr.bf16.mxu0 %v2594_v7  ;;  %v2620_v7 = vpack.c.bf16 %v442_v2, %v438_v1  ;;  %v479_v1 = vld [vmem:[%s3444_s2 + $0x298] sm:$0xff]  ;;  %v3821_v49 = vld [vmem:[%s3439_s5 + $0xb0] sm:$0xff] }
  0x9f   : > { %v483_v2 = vld [vmem:[%s3444_s2 + $0x2b8] sm:$0xff] }
  0xa1   : > { %2733 = vmatpush1.bf16.msra.mxu1 %v2596_v12  ;;  %2597 = vmatpush1.bf16.msra.mxu0 %v2596_v12  ;;  %v450_v12 = vld [vmem:[%s3444_s2 + $0x1b0] sm:$0xff] }
  0xa2   : > { %2599 = vmatprep.subr.bf16.mxu1 %v2598_v13  ;;  %v3699_v13 = vld [vmem:[%s3439_s5 + $0x68] sm:$0xff]  ;;  %v2624_v17 = vpack.c.bf16 %v450_v12, %v446_v11  ;;  %v2638_v12 = vpack.c.bf16 %v483_v2, %v479_v1  ;;  %v3839_v1 = vld [vmem:[%s3439_s5 + $0xc0] sm:$0xff]  ;;  %v3842_v2 = vld [vmem:[%s3439_s5 + $0x1d8] sm:$0xff] }
  0xa4   : > { %750 = vmatmul.mubr.f32.vlgmr.msra.gmra.mrb[0].mxu1 %v3578_v18  ;;  %654 = vmatmul.mubr.f32.vlgmr.msra.gmra.mrb[0].mxu0 %v3581_v20 }
  0xa5   : > { %2601 = vmatpush1.bf16.msra.mxu1 %v2600_v19  ;;  %2427 = vmatprep.mubr.msk.f32.mxu1 %vm492_vm0, %v3584_v21  ;;  %v3711_v19 = vld [vmem:[%s3439_s5 + $0x60] sm:$0xff] }
  0xa6   : > { %2603 = vmatprep.subr.bf16.mxu1 %v2602_v22  ;;  %2411 = vmatprep.mubr.msk.f32.mxu0 %vm492_vm0, %v3591_v27  ;;  %v3714_v22 = vld [vmem:[%s3439_s5 + $0x178] sm:$0xff] }
  0xa8   : > { %756 = vmatmul.mubr.f32.gmra.mrb[2].mxu1 %v3598_v28  ;;  %660 = vmatmul.mubr.f32.gmra.mrb[2].mxu0 %v3601_v30 }
  0xa9   : > { %2428 = vmatprep.mubr.msk.f32.mxu1 %vm492_vm0, %v3604_v31  ;;  %2605 = vmatpush1.bf16.msra.mxu1 %v2604_v29  ;;  %v463_v29 = vld [vmem:[%s3444_s2 + $0x218] sm:$0xff] }
  0xaa   : > { %2607 = vmatprep.subr.bf16.mxu1 %v2606_v32  ;;  %2412 = vmatprep.mubr.msk.f32.mxu0 %vm492_vm0, %v3613_v38  ;;  %v467_v32 = vld [vmem:[%s3444_s2 + $0x238] sm:$0xff] }
  0xac   : > { %762 = vmatmul.mubr.f32.gmra.mrb[4].mxu1 %v3620_v39  ;;  %666 = vmatmul.mubr.f32.gmra.mrb[4].mxu0 %v3623_v42 }
  0xad   : > { %2429 = vmatprep.mubr.msk.f32.mxu1 %vm492_vm0, %v3626_v43  ;;  %2609 = vmatpush1.bf16.msra.mxu1 %v2608_v41  ;;  %v2630_v41 = vpack.c.bf16 %v467_v32, %v463_v29  ;;  %v3804_v29 = vld [vmem:[%s3439_s5 + $0x1b8] sm:$0xff] }
  0xae   : > { %2611 = vmatprep.subr.bf16.mxu1 %v2610_v44  ;;  %2413 = vmatprep.mubr.msk.f32.mxu0 %vm492_vm0, %v3633_v47  ;;  %v462_v44 = vld [vmem:[%s3444_s2 + $0x210] sm:$0xff]  ;;  %v3807_v32 = vld [vmem:[%s3439_s5 + $0xb8] sm:$0xff] }
  0xaf   : > { %v2632_v55 = vpack.c.bf16 %v466_v45, %v462_v44  ;;  %v486_v44 = vld [vmem:[%s3444_s2 + $0x2d0] sm:$0xff] }
  0xb0   : > { %768 = vmatmul.mubr.f32.gmra.mrb[6].mxu1 %v3642_v50  ;;  %672 = vmatmul.mubr.f32.gmra.mrb[6].mxu0 %v3645_v52  ;;  %v490_v45 = vld [vmem:[%s3444_s2 + $0x2f0] sm:$0xff] }
  0xb1   : > { %2430 = vmatprep.mubr.msk.f32.mxu1 %vm492_vm0, %v3648_v53  ;;  %2613 = vmatpush1.bf16.msra.mxu1 %v2612_v51  ;;  %v3752_v51 = vld [vmem:[%s3439_s5 + $0x180] sm:$0xff] }
  0xb2   : > { %2615 = vmatprep.subr.bf16.mxu1 %v2614_v54  ;;  %2414 = vmatprep.mubr.msk.f32.mxu0 %vm492_vm0, %v3655_v57  ;;  %v3755_v54 = vld [vmem:[%s3439_s5 + $0x80] sm:$0xff] }
  0xb4   : > { %774 = vmatmul.mubr.f32.gmra.mrb[8].mxu1 %v3664_v60  ;;  %678 = vmatmul.mubr.f32.gmra.mrb[8].mxu0 %v3667_v62 }
  0xb5   : > { %2431 = vmatprep.mubr.msk.f32.mxu1 %vm492_vm0, %v3670_v63  ;;  %2617 = vmatpush1.bf16.msra.mxu1 %v2616_v61  ;;  %v470_v61 = vld [vmem:[%s3444_s2 + $0x250] sm:$0xff] }
  0xb6   : > { %2619 = vmatprep.subr.bf16.mxu1 %v2618_v0  ;;  %2415 = vmatprep.mubr.msk.f32.mxu0 %vm492_vm0, %v3677_v3  ;;  %v474_v0 = vld [vmem:[%s3444_s2 + $0x270] sm:$0xff] }
  0xb7   : > { %v2636_v11 = vpack.c.bf16 %v474_v0, %v470_v61  ;;  %v2644_v61 = vpack.c.bf16 %v490_v45, %v486_v44  ;;  %v3834_v0 = vld [vmem:[%s3439_s5 + $0x1c0] sm:$0xff]  ;;  %v3881_v44 = vld [vmem:[%s3439_s5 + $0xf8] sm:$0xff]  ;;  %v3888_v45 = vld [vmem:[%s3439_s5 + $0x1f0] sm:$0xff] }
  0xb8   : > { %780 = vmatmul.mubr.f32.gmra.mrb[10].mxu1 %v3686_v6  ;;  %684 = vmatmul.mubr.f32.gmra.mrb[10].mxu0 %v3689_v8 }
  0xb9   : > { %2432 = vmatprep.mubr.msk.f32.mxu1 %vm492_vm0, %v3692_v9  ;;  %2621 = vmatpush1.bf16.msra.mxu1 %v2620_v7  ;;  %v3780_v7 = vld [vmem:[%s3439_s5 + $0x1a8] sm:$0xff] }
  0xba   : > { %2623 = vmatprep.subr.bf16.mxu1 %v2622_v10  ;;  %2416 = vmatprep.mubr.msk.f32.mxu0 %vm492_vm0, %v3699_v13  ;;  %v3785_v10 = vld [vmem:[%s3439_s5 + $0xa8] sm:$0xff] }
  0xbc   : > { %786 = vmatmul.mubr.f32.gmra.mrb[12].mxu1 %v3708_v16  ;;  %690 = vmatmul.mubr.f32.gmra.mrb[12].mxu0 %v3711_v19 }
  0xbd   : > { %2433 = vmatprep.mubr.msk.f32.mxu1 %vm492_vm0, %v3714_v22  ;;  %2625 = vmatpush1.bf16.msra.mxu1 %v2624_v17  ;;  %v487_v17 = vld [vmem:[%s3444_s2 + $0x2d8] sm:$0xff] }
  0xbe   : > { %2417 = vmatprep.mubr.msk.f32.mxu0 %vm492_vm0, %v3721_v26  ;;  %2627 = vmatprep.subr.bf16.mxu1 %v2626_v23  ;;  %v491_v23 = vld [vmem:[%s3444_s2 + $0x2f8] sm:$0xff] }
  0xc0   : > { %792 = vmatmul.mubr.f32.gmra.mrb[14].mxu1 %v3730_v34  ;;  %696 = vmatmul.mubr.f32.gmra.mrb[14].mxu0 %v3733_v35 }
  0xc1   : > { %2434 = vmatprep.mubr.msk.f32.mxu1 %vm492_vm0, %v3736_v37  ;;  %2629 = vmatpush1.bf16.msra.mxu1 %v2628_v36  ;;  %v2640_v36 = vpack.c.bf16 %v482_v15, %v478_v14  ;;  %v3857_v14 = vld [vmem:[%s3439_s5 + $0xd0] sm:$0xff]  ;;  %v3860_v15 = vld [vmem:[%s3439_s5 + $0x1e8] sm:$0xff] }
  0xc2   : > { %2418 = vmatprep.mubr.msk.f32.mxu0 %vm492_vm0, %v3743_v46  ;;  %2631 = vmatprep.subr.bf16.mxu1 %v2630_v41  ;;  %v2642_v41 = vpack.c.bf16 %v491_v23, %v487_v17  ;;  %v3863_v17 = vld [vmem:[%s3439_s5 + $0xe8] sm:$0xff]  ;;  %v3870_v23 = vld [vmem:[%s3439_s5 + $0x1e0] sm:$0xff] }
  0xc4   : > { %798 = vmatmul.mubr.f32.gmra.mrb[16].mxu1 %v3752_v51  ;;  %702 = vmatmul.mubr.f32.gmra.mrb[16].mxu0 %v3755_v54 }
  0xc5   : > { %2435 = vmatprep.mubr.msk.f32.mxu1 %vm492_vm0, %v3758_v56  ;;  %2633 = vmatpush1.bf16.msra.mxu1 %v2632_v55  ;;  %v3824_v55 = vld [vmem:[%s3439_s5 + $0x1c8] sm:$0xff] }
  0xc6   : > { %2419 = vmatprep.mubr.msk.f32.mxu0 %vm492_vm0, %v3763_v59  ;;  %2635 = vmatprep.subr.bf16.mxu1 %v2634_v58  ;;  %v3827_v58 = vld [vmem:[%s3439_s5 + $0xc8] sm:$0xff] }
  0xc8   : > { %804 = vmatmul.mubr.f32.gmra.mrb[18].mxu1 %v3774_v4  ;;  %708 = vmatmul.mubr.f32.gmra.mrb[18].mxu0 %v3777_v5 }
  0xc9   : > { %2436 = vmatprep.mubr.msk.f32.mxu1 %vm492_vm0, %v3780_v7  ;;  %2420 = vmatprep.mubr.msk.f32.mxu0 %vm492_vm0, %v3785_v10 }
  0xca   : > { %2637 = vmatpush1.bf16.msra.mxu1 %v2636_v11  ;;  %v3845_v11 = vld [vmem:[%s3439_s5 + $0xd8] sm:$0xff] }
  0xcb   : > { %2639 = vmatprep.subr.bf16.mxu1 %v2638_v12  ;;  %v3852_v12 = vld [vmem:[%s3439_s5 + $0x1d0] sm:$0xff] }
  0xcc   : > { %810 = vmatmul.mubr.f32.gmra.mrb[20].mxu1 %v3796_v24  ;;  %714 = vmatmul.mubr.f32.gmra.mrb[20].mxu0 %v3801_v25 }
  0xcd   : > { %2437 = vmatprep.mubr.msk.f32.mxu1 %vm492_vm0, %v3804_v29  ;;  %2421 = vmatprep.mubr.msk.f32.mxu0 %vm492_vm0, %v3807_v32 }
  0xce   : > { %2641 = vmatpush1.bf16.msra.mxu1 %v2640_v36  ;;  %v3875_v36 = vld [vmem:[%s3439_s5 + $0xe0] sm:$0xff] }
  0xcf   : > { %2643 = vmatprep.subr.bf16.mxu1 %v2642_v41  ;;  %v3878_v41 = vld [vmem:[%s3439_s5 + $0x1f8] sm:$0xff] }
  0xd0   : > { %816 = vmatmul.mubr.f32.gmra.mrb[22].mxu1 %v3816_v48  ;;  %720 = vmatmul.mubr.f32.gmra.mrb[22].mxu0 %v3821_v49 }
  0xd1   : > { %2438 = vmatprep.mubr.msk.f32.mxu1 %vm492_vm0, %v3824_v55  ;;  %2422 = vmatprep.mubr.msk.f32.mxu0 %vm492_vm0, %v3827_v58 }
  0xd2   : > { %2645 = vmatpush1.bf16.msra.mxu1 %v2644_v61  ;;  %v3893_v61 = vld [vmem:[%s3439_s5 + $0xf0] sm:$0xff] }
  0xd4   : > { %822 = vmatmul.mubr.f32.gmra.mrb[24].mxu1 %v3834_v0  ;;  %726 = vmatmul.mubr.f32.gmra.mrb[24].mxu0 %v3839_v1 }
  0xd5   : > { %2439 = vmatprep.mubr.msk.f32.mxu1 %vm492_vm0, %v3842_v2  ;;  %2423 = vmatprep.mubr.msk.f32.mxu0 %vm492_vm0, %v3845_v11 }
  0xd8   : > { %828 = vmatmul.mubr.f32.gmra.mrb[26].mxu1 %v3852_v12  ;;  %732 = vmatmul.mubr.f32.gmra.mrb[26].mxu0 %v3857_v14 }
  0xd9   : > { %2440 = vmatprep.mubr.msk.f32.mxu1 %vm492_vm0, %v3860_v15  ;;  %2424 = vmatprep.mubr.msk.f32.mxu0 %vm492_vm0, %v3863_v17 }
  0xdc   : > { %834 = vmatmul.mubr.f32.gmra.mrb[28].mxu1 %v3870_v23  ;;  %738 = vmatmul.mubr.f32.gmra.mrb[28].mxu0 %v3875_v36 }
  0xdd   : > { %2441 = vmatprep.mubr.msk.f32.mxu1 %vm492_vm0, %v3878_v41  ;;  %2425 = vmatprep.mubr.msk.f32.mxu0 %vm492_vm0, %v3881_v44 }
  0xe0   : > { %840 = vmatmul.mubr.f32.gmra.mrb[30].mxu1 %v3888_v45  ;;  %744 = vmatmul.mubr.f32.gmra.mrb[30].mxu0 %v3893_v61 }
  0xe1   : > { %2442 = vmatprep.mubr.msk.f32.mxu1 %vm492_vm0, %v3545_v40  ;;  %v1680_v40 = vld [vmem:[%s3424_s29 + $0x8] sm:$0xff] }
  0xe4   : > { %911 = vmatmul.mubr.f32.vlgmr.msra.gmra.mrb[32].mxu1 %v3581_v20  ;;  %v1682_v20 = vld [vmem:[%s3424_s29 + $0x18] sm:$0xff] }
  0xe5   : > { %2443 = vmatprep.mubr.msk.f32.mxu1 %vm492_vm0, %v3591_v27  ;;  %v2646_v27 = vpack.c.bf16 %v1682_v20, %v1680_v40  ;;  %v1689_v40 = vld [vmem:[%s3424_s29 + $0x50] sm:$0xff]  ;;  %v1691_v20 = vld [vmem:[%s3424_s29 + $0x60] sm:$0xff] }
  0xe7   : > { %2647 = vmatprep.subr.bf16.mxu0 %v2646_v27  ;;  %v1693_v27 = vld [vmem:[%s3424_s29 + $0x70] sm:$0xff] }
  0xe8   : > { %917 = vmatmul.mubr.f32.gmra.mrb[34].mxu1 %v3601_v30  ;;  %v1679_v30 = vld [vmem:[%s3424_s29] sm:$0xff] }
  0xe9   : > { %2444 = vmatprep.mubr.msk.f32.mxu1 %vm492_vm0, %v3613_v38  ;;  %v1681_v38 = vld [vmem:[%s3424_s29 + $0x10] sm:$0xff] }
  0xec   : > { %923 = vmatmul.mubr.f32.gmra.mrb[36].mxu1 %v3623_v42  ;;  %v2648_v42 = vpack.c.bf16 %v1681_v38, %v1679_v30  ;;  %v1698_v30 = vld [vmem:[%s3424_s29 + $0x98] sm:$0xff]  ;;  %v1695_v38 = vld [vmem:[%s3424_s29 + $0x80] sm:$0xff] }
  0xed   : > { %2445 = vmatprep.mubr.msk.f32.mxu1 %vm492_vm0, %v3633_v47  ;;  %v1684_v47 = vld [vmem:[%s3424_s29 + $0x28] sm:$0xff] }
  0xee   : > { %2649 = vmatpush1.bf16.msra.mxu0 %v2648_v42  ;;  %v1697_v42 = vld [vmem:[%s3424_s29 + $0x90] sm:$0xff] }
  0xf0   : > { %929 = vmatmul.mubr.f32.gmra.mrb[38].mxu1 %v3645_v52  ;;  %v1686_v52 = vld [vmem:[%s3424_s29 + $0x38] sm:$0xff] }
  0xf1   : > { %2446 = vmatprep.mubr.msk.f32.mxu1 %vm492_vm0, %v3655_v57  ;;  %v2650_v57 = vpack.c.bf16 %v1686_v52, %v1684_v47  ;;  %v2664_v47 = vpack.c.bf16 %v1697_v42, %v1695_v38  ;;  %v1737_v38 = vld [vmem:[%s3424_s29 + $0x1d0] sm:$0xff]  ;;  %v1740_v42 = vld [vmem:[%s3424_s29 + $0x1e8] sm:$0xff] }
  0xf3   : > { %2651 = vmatprep.subr.bf16.mxu0 %v2650_v57  ;;  %v1699_v57 = vld [vmem:[%s3424_s29 + $0xa0] sm:$0xff] }
  0xf4   : > { %935 = vmatmul.mubr.f32.gmra.mrb[40].mxu1 %v3667_v62  ;;  %v1683_v62 = vld [vmem:[%s3424_s29 + $0x20] sm:$0xff] }
  0xf5   : > { %2447 = vmatprep.mubr.msk.f32.mxu1 %vm492_vm0, %v3677_v3  ;;  %v1685_v3 = vld [vmem:[%s3424_s29 + $0x30] sm:$0xff] }
  0xf8   : > { %941 = vmatmul.mubr.f32.gmra.mrb[42].mxu1 %v3689_v8  ;;  %v2652_v8 = vpack.c.bf16 %v1685_v3, %v1683_v62 }
  0xf9   : > { %2448 = vmatprep.mubr.msk.f32.mxu1 %vm492_vm0, %v3699_v13  ;;  %v1688_v13 = vld [vmem:[%s3424_s29 + $0x48] sm:$0xff] }
  0xfa   : > { %2653 = vmatpush1.bf16.msra.mxu0 %v2652_v8  ;;  %v1705_v8 = vld [vmem:[%s3424_s29 + $0xd0] sm:$0xff] }
  0xfc   : > { %947 = vmatmul.mubr.f32.gmra.mrb[44].mxu1 %v3711_v19  ;;  %v1690_v19 = vld [vmem:[%s3424_s29 + $0x58] sm:$0xff] }
  0xfd   : > { %2449 = vmatprep.mubr.msk.f32.mxu1 %vm492_vm0, %v3721_v26  ;;  %v2654_v26 = vpack.c.bf16 %v1690_v19, %v1688_v13  ;;  %v1707_v13 = vld [vmem:[%s3424_s29 + $0xe0] sm:$0xff] }
  0xff   : > { %2655 = vmatprep.subr.bf16.mxu0 %v2654_v26  ;;  %v1713_v26 = vld [vmem:[%s3424_s29 + $0x110] sm:$0xff] }
 0x100   : > { %953 = vmatmul.mubr.f32.gmra.mrb[46].mxu1 %v3733_v35  ;;  %v1687_v35 = vld [vmem:[%s3424_s29 + $0x40] sm:$0xff] }
 0x101   : > { %2450 = vmatprep.mubr.msk.f32.mxu1 %vm492_vm0, %v3743_v46  ;;  %v2656_v46 = vpack.c.bf16 %v1689_v40, %v1687_v35 }
 0x103   : > { %2657 = vmatpush1.bf16.msra.mxu0 %v2656_v46  ;;  %v1715_v46 = vld [vmem:[%s3424_s29 + $0x120] sm:$0xff] }
 0x104   : > { %959 = vmatmul.mubr.f32.gmra.mrb[48].mxu1 %v3755_v54  ;;  %v1692_v54 = vld [vmem:[%s3424_s29 + $0x68] sm:$0xff] }
 0x105   : > { %2451 = vmatprep.mubr.msk.f32.mxu1 %vm492_vm0, %v3763_v59  ;;  %v1694_v59 = vld [vmem:[%s3424_s29 + $0x78] sm:$0xff] }
 0x108   : > { %965 = vmatmul.mubr.f32.gmra.mrb[50].mxu1 %v3777_v5  ;;  %v2658_v5 = vpack.c.bf16 %v1694_v59, %v1692_v54  ;;  %v1717_v54 = vld [vmem:[%s3424_s29 + $0x130] sm:$0xff]  ;;  %v1723_v59 = vld [vmem:[%s3424_s29 + $0x160] sm:$0xff] }
 0x109   : > { %2452 = vmatprep.mubr.msk.f32.mxu1 %vm492_vm0, %v3785_v10  ;;  %v2660_v10 = vpack.c.bf16 %v1693_v27, %v1691_v20  ;;  %v1730_v20 = vld [vmem:[%s3424_s29 + $0x198] sm:$0xff] }
 0x10a   : > { %2659 = vmatprep.subr.bf16.mxu0 %v2658_v5  ;;  %v1725_v5 = vld [vmem:[%s3424_s29 + $0x170] sm:$0xff] }
 0x10b   : > { %2661 = vmatpush1.bf16.msra.mxu0 %v2660_v10  ;;  %v1729_v10 = vld [vmem:[%s3424_s29 + $0x190] sm:$0xff] }
 0x10c   : > { %971 = vmatmul.mubr.f32.gmra.mrb[52].mxu1 %v3801_v25  ;;  %v1696_v25 = vld [vmem:[%s3424_s29 + $0x88] sm:$0xff] }
 0x10d   : > { %2453 = vmatprep.mubr.msk.f32.mxu1 %vm492_vm0, %v3807_v32  ;;  %v2662_v32 = vpack.c.bf16 %v1698_v30, %v1696_v25  ;;  %v1731_v25 = vld [vmem:[%s3424_s29 + $0x1a0] sm:$0xff] }
 0x10f   : > { %2663 = vmatprep.subr.bf16.mxu0 %v2662_v32  ;;  %v1735_v32 = vld [vmem:[%s3424_s29 + $0x1c0] sm:$0xff] }
 0x110   : > { %977 = vmatmul.mubr.f32.gmra.mrb[54].mxu1 %v3821_v49  ;;  %2665 = vmatpush1.bf16.msra.mxu0 %v2664_v47  ;;  %v1700_v49 = vld [vmem:[%s3424_s29 + $0xa8] sm:$0xff]  ;;  %v1742_v47 = vld [vmem:[%s3424_s29 + $0x1f8] sm:$0xff] }
 0x111   : > { %2454 = vmatprep.mubr.msk.f32.mxu1 %vm492_vm0, %v3827_v58  ;;  %v1702_v58 = vld [vmem:[%s3424_s29 + $0xb8] sm:$0xff] }
 0x112   : > { %v2666_v52 = vpack.c.bf16 %v1702_v58, %v1700_v49  ;;  %v2706_v49 = vpack.c.bf16 %v1742_v47, %v1740_v42  ;;  %v1739_v58 = vld [vmem:[%s3424_s29 + $0x1e0] sm:$0xff] }
 0x114   : > { %983 = vmatmul.mubr.f32.gmra.mrb[56].mxu1 %v3839_v1  ;;  %v1701_v1 = vld [vmem:[%s3424_s29 + $0xb0] sm:$0xff]  ;;  %2667 = vmatprep.subr.bf16.mxu0 %v2666_v52 }
 0x115   : > { %2455 = vmatprep.mubr.msk.f32.mxu1 %vm492_vm0, %v3845_v11  ;;  %v2668_v62 = vpack.c.bf16 %v1701_v1, %v1699_v57  ;;  %v1704_v11 = vld [vmem:[%s3424_s29 + $0xc8] sm:$0xff] }
 0x117   : > { %2669 = vmatpush1.bf16.msra.mxu0 %v2668_v62 }
 0x118   : > { %989 = vmatmul.mubr.f32.gmra.mrb[58].mxu1 %v3857_v14  ;;  %v1706_v14 = vld [vmem:[%s3424_s29 + $0xd8] sm:$0xff] }
 0x119   : > { %2456 = vmatprep.mubr.msk.f32.mxu1 %vm492_vm0, %v3863_v17  ;;  %v2670_v3 = vpack.c.bf16 %v1706_v14, %v1704_v11  ;;  %v1703_v17 = vld [vmem:[%s3424_s29 + $0xc0] sm:$0xff] }
 0x11b   : > { %2671 = vmatprep.subr.bf16.mxu0 %v2670_v3 }
 0x11c   : > { %995 = vmatmul.mubr.f32.gmra.mrb[60].mxu1 %v3875_v36  ;;  %v2672_v36 = vpack.c.bf16 %v1705_v8, %v1703_v17 }
 0x11d   : > { %2457 = vmatprep.mubr.msk.f32.mxu1 %vm492_vm0, %v3881_v44  ;;  %v1708_v44 = vld [vmem:[%s3424_s29 + $0xe8] sm:$0xff] }
 0x11e   : > { %2673 = vmatpush1.bf16.msra.mxu0 %v2672_v36 }
 0x120   : > { %1001 = vmatmul.mubr.f32.gmra.mrb[62].mxu1 %v3893_v61 }
 0x121   : > { %2458 = vmatprep.mubr.msk.f32.mxu1 %vm492_vm0, %v3536_v33  ;;  %v1710_v33 = vld [vmem:[%s3424_s29 + $0xf8] sm:$0xff] }
 0x122   : > { %v2674_v61 = vpack.c.bf16 %v1710_v33, %v1708_v44 }
 0x124   : > { %1007 = vmatmul.mubr.f32.gmra.mrb[64].mxu1 %v3578_v18  ;;  %v1709_v18 = vld [vmem:[%s3424_s29 + $0xf0] sm:$0xff]  ;;  %2675 = vmatprep.subr.bf16.mxu0 %v2674_v61 }
 0x125   : > { %2459 = vmatprep.mubr.msk.f32.mxu1 %vm492_vm0, %v3584_v21  ;;  %v2676_v19 = vpack.c.bf16 %v1709_v18, %v1707_v13  ;;  %v1712_v21 = vld [vmem:[%s3424_s29 + $0x108] sm:$0xff] }
 0x127   : > { %2677 = vmatpush1.bf16.msra.mxu0 %v2676_v19 }
 0x128   : > { %1013 = vmatmul.mubr.f32.gmra.mrb[66].mxu1 %v3598_v28  ;;  %v1714_v28 = vld [vmem:[%s3424_s29 + $0x118] sm:$0xff] }
 0x129   : > { %2460 = vmatprep.mubr.msk.f32.mxu1 %vm492_vm0, %v3604_v31  ;;  %v2678_v31 = vpack.c.bf16 %v1714_v28, %v1712_v21 }
 0x12b   : > { %2679 = vmatprep.subr.bf16.mxu0 %v2678_v31 }
 0x12c   : > { %1019 = vmatmul.mubr.f32.gmra.mrb[68].mxu1 %v3620_v39  ;;  %v1711_v39 = vld [vmem:[%s3424_s29 + $0x100] sm:$0xff] }
 0x12d   : > { %2461 = vmatprep.mubr.msk.f32.mxu1 %vm492_vm0, %v3626_v43  ;;  %v2680_v35 = vpack.c.bf16 %v1713_v26, %v1711_v39  ;;  %v1716_v43 = vld [vmem:[%s3424_s29 + $0x128] sm:$0xff] }
 0x12f   : > { %2681 = vmatpush1.bf16.msra.mxu0 %v2680_v35 }
 0x130   : > { %1025 = vmatmul.mubr.f32.gmra.mrb[70].mxu1 %v3642_v50  ;;  %v1718_v50 = vld [vmem:[%s3424_s29 + $0x138] sm:$0xff] }
 0x131   : > { %2462 = vmatprep.mubr.msk.f32.mxu1 %vm492_vm0, %v3648_v53  ;;  %v2682_v40 = vpack.c.bf16 %v1718_v50, %v1716_v43  ;;  %v2684_v53 = vpack.c.bf16 %v1717_v54, %v1715_v46 }
 0x133   : > { %2683 = vmatprep.subr.bf16.mxu0 %v2682_v40 }
 0x134   : > { %1031 = vmatmul.mubr.f32.gmra.mrb[72].mxu1 %v3664_v60  ;;  %2685 = vmatpush1.bf16.msra.mxu0 %v2684_v53  ;;  %v1720_v60 = vld [vmem:[%s3424_s29 + $0x148] sm:$0xff] }
 0x135   : > { %2463 = vmatprep.mubr.msk.f32.mxu1 %vm492_vm0, %v3670_v63  ;;  %v1722_v63 = vld [vmem:[%s3424_s29 + $0x158] sm:$0xff] }
 0x138   : > { %1037 = vmatmul.mubr.f32.gmra.mrb[74].mxu1 %v3686_v6  ;;  %v2686_v6 = vpack.c.bf16 %v1722_v63, %v1720_v60 }
 0x139   : > { %2464 = vmatprep.mubr.msk.f32.mxu1 %vm492_vm0, %v3692_v9  ;;  %v1719_v9 = vld [vmem:[%s3424_s29 + $0x140] sm:$0xff] }
 0x13a   : > { %2687 = vmatprep.subr.bf16.mxu0 %v2686_v6 }
 0x13c   : > { %1043 = vmatmul.mubr.f32.gmra.mrb[76].mxu1 %v3708_v16  ;;  %v1721_v16 = vld [vmem:[%s3424_s29 + $0x150] sm:$0xff] }
 0x13d   : > { %2465 = vmatprep.mubr.msk.f32.mxu1 %vm492_vm0, %v3714_v22  ;;  %v2688_v22 = vpack.c.bf16 %v1721_v16, %v1719_v9 }
 0x13f   : > { %2689 = vmatpush1.bf16.msra.mxu0 %v2688_v22 }
 0x140   : > { %1049 = vmatmul.mubr.f32.gmra.mrb[78].mxu1 %v3730_v34  ;;  %v1724_v34 = vld [vmem:[%s3424_s29 + $0x168] sm:$0xff] }
 0x141   : > { %2466 = vmatprep.mubr.msk.f32.mxu1 %vm492_vm0, %v3736_v37  ;;  %v1726_v37 = vld [vmem:[%s3424_s29 + $0x178] sm:$0xff] }
 0x144   : > { %1055 = vmatmul.mubr.f32.gmra.mrb[80].mxu1 %v3752_v51  ;;  %v2690_v51 = vpack.c.bf16 %v1726_v37, %v1724_v34 }
 0x145   : > { %2467 = vmatprep.mubr.msk.f32.mxu1 %vm492_vm0, %v3758_v56  ;;  %v2692_v56 = vpack.c.bf16 %v1725_v5, %v1723_v59 }
 0x146   : > { %2691 = vmatprep.subr.bf16.mxu0 %v2690_v51 }
 0x147   : > { %2693 = vmatpush1.bf16.msra.mxu0 %v2692_v56 }
 0x148   : > { %1061 = vmatmul.mubr.f32.gmra.mrb[82].mxu1 %v3774_v4  ;;  %v1728_v4 = vld [vmem:[%s3424_s29 + $0x188] sm:$0xff] }
 0x149   : > { %2468 = vmatprep.mubr.msk.f32.mxu1 %vm492_vm0, %v3780_v7  ;;  %v2694_v27 = vpack.c.bf16 %v1730_v20, %v1728_v4  ;;  %v1727_v7 = vld [vmem:[%s3424_s29 + $0x180] sm:$0xff] }
 0x14b   : > { %2695 = vmatprep.subr.bf16.mxu0 %v2694_v27 }
 0x14c   : > { %1067 = vmatmul.mubr.f32.gmra.mrb[84].mxu1 %v3796_v24  ;;  %v2696_v24 = vpack.c.bf16 %v1729_v10, %v1727_v7 }
 0x14d   : > { %2469 = vmatprep.mubr.msk.f32.mxu1 %vm492_vm0, %v3804_v29  ;;  %v1732_v29 = vld [vmem:[%s3424_s29 + $0x1a8] sm:$0xff] }
 0x14e   : > { %2697 = vmatpush1.bf16.msra.mxu0 %v2696_v24 }
 0x150   : > { %1073 = vmatmul.mubr.f32.gmra.mrb[86].mxu1 %v3816_v48  ;;  %v1734_v48 = vld [vmem:[%s3424_s29 + $0x1b8] sm:$0xff] }
 0x151   : > { %2470 = vmatprep.mubr.msk.f32.mxu1 %vm492_vm0, %v3824_v55  ;;  %v2698_v55 = vpack.c.bf16 %v1734_v48, %v1732_v29 }
 0x153   : > { %2699 = vmatprep.subr.bf16.mxu0 %v2698_v55 }
 0x154   : > { %1079 = vmatmul.mubr.f32.gmra.mrb[88].mxu1 %v3834_v0  ;;  %v1733_v0 = vld [vmem:[%s3424_s29 + $0x1b0] sm:$0xff] }
 0x155   : > { %2471 = vmatprep.mubr.msk.f32.mxu1 %vm492_vm0, %v3842_v2  ;;  %v2700_v2 = vpack.c.bf16 %v1733_v0, %v1731_v25 }
 0x157   : > { %2701 = vmatpush1.bf16.msra.mxu0 %v2700_v2 }
 0x158   : > { %1085 = vmatmul.mubr.f32.gmra.mrb[90].mxu1 %v3852_v12  ;;  %v1736_v12 = vld [vmem:[%s3424_s29 + $0x1c8] sm:$0xff] }
 0x159   : > { %2472 = vmatprep.mubr.msk.f32.mxu1 %vm492_vm0, %v3860_v15  ;;  %v1738_v15 = vld [vmem:[%s3424_s29 + $0x1d8] sm:$0xff] }
 0x15a   : > { %v2702_v30 = vpack.c.bf16 %v1738_v15, %v1736_v12 }
 0x15c   : > { %1091 = vmatmul.mubr.f32.gmra.mrb[92].mxu1 %v3870_v23  ;;  %v2704_v23 = vpack.c.bf16 %v1737_v38, %v1735_v32  ;;  %2703 = vmatprep.subr.bf16.mxu0 %v2702_v30 }
 0x15d   : > { %2473 = vmatprep.mubr.msk.f32.mxu1 %vm492_vm0, %v3878_v41  ;;  %v1741_v41 = vld [vmem:[%s3424_s29 + $0x1f0] sm:$0xff] }
 0x15e   : > { %2705 = vmatpush1.bf16.msra.mxu0 %v2704_v23  ;;  %v2708_v52 = vpack.c.bf16 %v1741_v41, %v1739_v58 }
 0x15f   : > { %2707 = vmatprep.subr.bf16.mxu0 %v2706_v49 }
 0x160   : > { %1097 = vmatmul.mubr.f32.gmra.mrb[94].mxu1 %v3888_v45 }
 0x162   : > { %2709 = vmatpush1.bf16.msra.mxu0 %v2708_v52 }
 0x177   : > { %v4057_v57 = vpop.f32.mrb[0].mxu1  ;;  %v4059_v1 = vpop.f32.mrb[0].mxu0 }
 0x178   : > { %4625 = vst [vmem:[#allocation11_spill] sm:$0xff] %v4057_v57  ;;  %v4061_v45 = vpop.f32.mrb[1].mxu1  ;;  %v4063_v62 = vpop.f32.mrb[1].mxu0  ;;  %v2474_v60 = vmul.f32 -1.442695, %v4059_v1 }
 0x179   : > { %4626 = vst [vmem:[#allocation12_spill] sm:$0xff] %v4061_v45  ;;  %v2475_v22 = vmul.f32 -1.442695, %v4063_v62  ;;  %v2506_v29 = vmul.f32 -1.442695, %v4057_v57 }
 0x17a   : > { %2842 = vpow2.f32 %v2474_v60  ;;  %v2507_v30 = vmul.f32 -1.442695, %v4061_v45 }
 0x17b   : > { %v4065_v11 = vpop.f32.mrb[2].mxu1  ;;  %v4067_v14 = vpop.f32.mrb[2].mxu0  ;;  %2844 = vpow2.f32 %v2475_v22 }
 0x17c   : > { %4627 = vst [vmem:[#allocation13_spill] sm:$0xff] %v4065_v11  ;;  %v4069_v3 = vpop.f32.mrb[3].mxu1  ;;  %v4071_v17 = vpop.f32.mrb[3].mxu0  ;;  %v2476_v34 = vmul.f32 -1.442695, %v4067_v14 }
 0x17d   : > { %4628 = vst [vmem:[#allocation14_spill] sm:$0xff] %v4069_v3  ;;  %v2477_v5 = vmul.f32 -1.442695, %v4071_v17 }
 0x17e   : > { %2846 = vpow2.f32 %v2476_v34 }
 0x17f   : > { %v4073_v8 = vpop.f32.mrb[4].mxu1  ;;  %v4075_v36 = vpop.f32.mrb[4].mxu0  ;;  %2848 = vpow2.f32 %v2477_v5 }
 0x180   : > { %v4077_v44 = vpop.f32.mrb[5].mxu1  ;;  %v4079_v33 = vpop.f32.mrb[5].mxu0  ;;  %v2478_v4 = vmul.f32 -1.442695, %v4075_v36 }
 0x181   : > { %v2479_v7 = vmul.f32 -1.442695, %v4079_v33 }
 0x182   : > { %2850 = vpow2.f32 %v2478_v4 }
 0x183   : > { %v4081_v61 = vpop.f32.mrb[6].mxu1  ;;  %v4083_v13 = vpop.f32.mrb[6].mxu0  ;;  %2852 = vpow2.f32 %v2479_v7 }
 0x184   : > { %v4085_v18 = vpop.f32.mrb[7].mxu1  ;;  %v4087_v19 = vpop.f32.mrb[7].mxu0  ;;  %v2480_v0 = vmul.f32 -1.442695, %v4083_v13  ;;  %2854 = vpow2.f32 %v2506_v29 }
 0x185   : > { %v2843_v25 = vpop.eup %2842  ;;  %v2481_v15 = vmul.f32 -1.442695, %v4087_v19 }
 0x186   : > { %v2845_v32 = vpop.eup %2844  ;;  %v1295_v38 = vadd.f32 1.0, %v2843_v25  ;;  %2856 = vpow2.f32 %v2480_v0 }
 0x187   : > { %v4089_v21 = vpop.f32.mrb[8].mxu1  ;;  %v4091_v28 = vpop.f32.mrb[8].mxu0  ;;  %2858 = vpow2.f32 %v2481_v15  ;;  %v1296_v60 = vadd.f32 1.0, %v2845_v32 }
 0x188   : > { %v4093_v31 = vpop.f32.mrb[9].mxu1  ;;  %v4095_v39 = vpop.f32.mrb[9].mxu0  ;;  %v2482_v47 = vmul.f32 -1.442695, %v4091_v28  ;;  %2860 = vpow2.f32 %v2507_v30 }
 0x189   : > { %v2847_v58 = vpop.eup %2846  ;;  %v2483_v41 = vmul.f32 -1.442695, %v4095_v39  ;;  %2862 = vrcp.f32 %v1295_v38  ;;  %v2508_v38 = vmul.f32 -1.442695, %v4065_v11 }
 0x18a   : > { %v2849_v22 = vpop.eup %2848  ;;  %v1297_v7 = vadd.f32 1.0, %v2847_v58  ;;  %2864 = vpow2.f32 %v2482_v47 }
 0x18b   : > { %v4097_v26 = vpop.f32.mrb[10].mxu1  ;;  %v4099_v35 = vpop.f32.mrb[10].mxu0  ;;  %2866 = vpow2.f32 %v2483_v41  ;;  %v1298_v32 = vadd.f32 1.0, %v2849_v22 }
 0x18c   : > { %v4101_v43 = vpop.f32.mrb[11].mxu1  ;;  %v4103_v50 = vpop.f32.mrb[11].mxu0  ;;  %v2484_v34 = vmul.f32 -1.442695, %v4099_v35  ;;  %2868 = vrcp.f32 %v1296_v60 }
 0x18d   : > { %v2851_v25 = vpop.eup %2850  ;;  %v2485_v0 = vmul.f32 -1.442695, %v4103_v50 }
 0x18e   : > { %v2853_v30 = vpop.eup %2852  ;;  %2870 = vpow2.f32 %v2484_v34  ;;  %v1299_v47 = vadd.f32 1.0, %v2851_v25 }
 0x18f   : > { %v4105_v40 = vpop.f32.mrb[12].mxu1  ;;  %v4107_v46 = vpop.f32.mrb[12].mxu0  ;;  %2872 = vrcp.f32 %v1297_v7 }
 0x190   : > { %v4109_v54 = vpop.f32.mrb[13].mxu1  ;;  %v4111_v53 = vpop.f32.mrb[13].mxu0  ;;  %2874 = vpow2.f32 %v2485_v0  ;;  %v2486_v60 = vmul.f32 -1.442695, %v4107_v46 }
 0x191   : > { %v4184_v41 = vpop.eup %2854  ;;  %2876 = vrcp.f32 %v1298_v32  ;;  %v2487_v34 = vmul.f32 -1.442695, %v4111_v53 }
 0x192   : > { %2878 = vpow2.f32 %v2508_v38 }
 0x193   : > { %v4114_v63 = vpop.f32.mrb[14].mxu1  ;;  %v4116_v6 = vpop.f32.mrb[14].mxu0  ;;  %2880 = vrcp.f32 %v1299_v47 }
 0x194   : > { %v4118_v9 = vpop.f32.mrb[15].mxu1  ;;  %v4120_v16 = vpop.f32.mrb[15].mxu0 }
 0x195   : > { %4629 = vst [vmem:[#allocation15_spill] sm:$0xff] %v4118_v9  ;;  %v2489_v47 = vmul.f32 -1.442695, %v4120_v16 }
 0x197   : > { %v4124_v37 = vpop.f32.mrb[16].mxu1  ;;  %v4126_v51 = vpop.f32.mrb[16].mxu0 }
 0x198   : > { %4630 = vst [vmem:[#allocation16_spill] sm:$0xff] %v4124_v37  ;;  %v4128_v59 = vpop.f32.mrb[17].mxu1  ;;  %v4131_v56 = vpop.f32.mrb[17].mxu0 }
 0x199   : > { %4631 = vst [vmem:[#allocation17_spill] sm:$0xff] %v4128_v59 }
 0x19b   : > { %v4134_v20 = vpop.f32.mrb[18].mxu1  ;;  %v4136_v27 = vpop.f32.mrb[18].mxu0 }
 0x19c   : > { %4632 = vst [vmem:[#allocation18_spill] sm:$0xff] %v4134_v20  ;;  %v4139_v10 = vpop.f32.mrb[19].mxu1  ;;  %v4141_v24 = vpop.f32.mrb[19].mxu0 }
 0x19d   : > { %4633 = vst [vmem:[#allocation19_spill] sm:$0xff] %v4139_v10 }
 0x19f   : > { %v4144_v48 = vpop.f32.mrb[20].mxu1  ;;  %v4146_v55 = vpop.f32.mrb[20].mxu0 }
 0x1a0   : > { %4634 = vst [vmem:[#allocation20_spill] sm:$0xff] %v4144_v48  ;;  %v4149_v2 = vpop.f32.mrb[21].mxu1  ;;  %v4151_v12 = vpop.f32.mrb[21].mxu0 }
 0x1a1   : > { %4635 = vst [vmem:[#allocation21_spill] sm:$0xff] %v4149_v2  ;;  %v2857_v2 = vpop.eup %2856 }
 0x1a2   : > { %v2859_v22 = vpop.eup %2858  ;;  %v1301_v32 = vadd.f32 1.0, %v2857_v2 }
 0x1a3   : > { %v4155_v23 = vpop.f32.mrb[22].mxu1  ;;  %v4157_v42 = vpop.f32.mrb[22].mxu0  ;;  %v1302_v38 = vadd.f32 1.0, %v2859_v22 }
 0x1a4   : > { %4636 = vst [vmem:[#allocation22_spill] sm:$0xff] %v4155_v23  ;;  %v4160_v49 = vpop.f32.mrb[23].mxu1  ;;  %v4163_v52 = vpop.f32.mrb[23].mxu0  ;;  %v1300_v23 = vadd.f32 1.0, %v2853_v30 }
 0x1a5   : > { %4637 = vst [vmem:[#allocation23_spill] sm:$0xff] %v4160_v49  ;;  %v4192_v25 = vpop.eup %2860 }
 0x1a6   : > { %v2863_v30 = vpop.eup %2862  ;;  %2882 = vrcp.f32 %v1300_v23 }
 0x1a7   : > { %v4166_v5 = vpop.f32.mrb[24].mxu1  ;;  %v4168_v4 = vpop.f32.mrb[24].mxu0  ;;  %2884 = vpow2.f32 %v2486_v60  ;;  %v1487_v22 = vmul.f32 %v2863_v30, %v4059_v1 }
 0x1a8   : > { %4638 = vst [vmem:[#allocation24_spill] sm:$0xff] %v4166_v5  ;;  %v4170_v29 = vpop.f32.mrb[25].mxu1  ;;  %v4173_v15 = vpop.f32.mrb[25].mxu0  ;;  %2886 = vpow2.f32 %v2487_v34 }
 0x1a9   : > { %4639 = vst [vmem:[#allocation25_spill] sm:$0xff] %v4170_v29  ;;  %v2865_v11 = vpop.eup %2864 }
 0x1aa   : > { %v2867_v10 = vpop.eup %2866  ;;  %v1303_v23 = vadd.f32 1.0, %v2865_v11  ;;  %v2490_v11 = vmul.f32 -1.442695, %v4126_v51 }
 0x1ab   : > { %v4176_v49 = vpop.f32.mrb[26].mxu1  ;;  %v4178_v5 = vpop.f32.mrb[26].mxu0  ;;  %v1304_v34 = vadd.f32 1.0, %v2867_v10 }
 0x1ac   : > { %4640 = vst [vmem:[#allocation26_spill] sm:$0xff] %v4176_v49  ;;  %v4180_v58 = vpop.f32.mrb[27].mxu1  ;;  %v4182_v29 = vpop.f32.mrb[27].mxu0 }
 0x1ad   : > { %4641 = vst [vmem:[#allocation27_spill] sm:$0xff] %v4180_v58  ;;  %v2509_v58 = vmul.f32 -1.442695, %v4069_v3  ;;  %v2869_v3 = vpop.eup %2868 }
 0x1ae   : > { %v2871_v2 = vpop.eup %2870  ;;  %v1488_v37 = vmul.f32 %v2869_v3, %v4063_v62  ;;  %v2511_v62 = vmul.f32 -1.442695, %v4077_v44 }
 0x1af   : > { %v4188_v49 = vpop.f32.mrb[28].mxu1  ;;  %v4190_v7 = vpop.f32.mrb[28].mxu0  ;;  %2888 = vpow2.f32 %v2509_v58  ;;  %v1305_v9 = vadd.f32 1.0, %v2871_v2 }
 0x1b0   : > { %4642 = vst [vmem:[#allocation28_spill] sm:$0xff] %v4188_v49  ;;  %v4195_v48 = vpop.f32.mrb[29].mxu1  ;;  %v4197_v0 = vpop.f32.mrb[29].mxu0  ;;  %v2488_v49 = vmul.f32 -1.442695, %v4116_v6  ;;  %2890 = vrcp.f32 %v1301_v32 }
 0x1b1   : > { %4643 = vst [vmem:[#allocation29_spill] sm:$0xff] %v4195_v48  ;;  %4644 = vst [vmem:[#allocation30_spill] sm:$0xff] %v4197_v0  ;;  %v2873_v60 = vpop.eup %2872  ;;  %2892 = vrcp.f32 %v1302_v38 }
 0x1b2   : > { %v2875_v59 = vpop.eup %2874  ;;  %2894 = vpow2.f32 %v2488_v49  ;;  %v1489_v10 = vmul.f32 %v2873_v60, %v4067_v14  ;;  %v2491_v14 = vmul.f32 -1.442695, %v4131_v56 }
 0x1b3   : > { %v4200_v45 = vpop.f32.mrb[30].mxu1  ;;  %v4202_v20 = vpop.f32.mrb[30].mxu0  ;;  %2896 = vpow2.f32 %v2489_v47  ;;  %v1306_v30 = vadd.f32 1.0, %v2875_v59 }
 0x1b4   : > { %4645 = vst [vmem:[#allocation31_spill] sm:$0xff] %v4200_v45  ;;  %4646 = vst [vmem:[#allocation32_spill] sm:$0xff] %v4202_v20  ;;  %v4205_v48 = vpop.f32.mrb[31].mxu1  ;;  %v4207_v57 = vpop.f32.mrb[31].mxu0  ;;  %v2510_v45 = vmul.f32 -1.442695, %v4073_v8  ;;  %2898 = vrcp.f32 %v1303_v23 }
 0x1b5   : > { %4647 = vst [vmem:[#allocation33_spill] sm:$0xff] %v4205_v48  ;;  %4648 = vst [vmem:[#allocation34_spill] sm:$0xff] %v4207_v57  ;;  %v2877_v20 = vpop.eup %2876  ;;  %2900 = vrcp.f32 %v1304_v34 }
 0x1b6   : > { %v2879_v0 = vpop.eup %2878  ;;  %2902 = vpow2.f32 %v2510_v45  ;;  %v1490_v3 = vmul.f32 %v2877_v20, %v4071_v17 }
 0x1b7   : > { %v912_v58 = vpop.f32.mrb[32].mxu1  ;;  %v2881_v1 = vpop.eup %2880  ;;  %2904 = vrcp.f32 %v1305_v9 }
 0x1b8   : > { %v1551_v48 = vmul.f32 %v1487_v22, %v912_v58  ;;  %v914_v57 = vpop.f32.mrb[33].mxu1  ;;  %v2883_v38 = vpop.eup %2882  ;;  %2906 = vpow2.f32 %v2490_v11  ;;  %v1491_v45 = vmul.f32 %v2881_v1, %v4075_v36 }
 0x1b9   : > { %v1552_v32 = vmul.f32 %v1488_v37, %v914_v57  ;;  %v2885_v47 = vpop.eup %2884  ;;  %2908 = vrcp.f32 %v1306_v30  ;;  %v1492_v17 = vmul.f32 %v2883_v38, %v4079_v33  ;;  %v1327_v33 = vadd.f32 1.0, %v4184_v41 }
 0x1ba   : > { %v2887_v22 = vpop.eup %2886  ;;  %v1307_v57 = vadd.f32 1.0, %v2885_v47  ;;  %2910 = vpow2.f32 %v2511_v62 }
 0x1bb   : > { %v918_v49 = vpop.f32.mrb[34].mxu1  ;;  %1807 = vmatprep.mubr.f32.mxu0 %v1552_v32  ;;  %v2889_v59 = vpop.eup %2888  ;;  %v1308_v60 = vadd.f32 1.0, %v2887_v22 }
 0x1bc   : > { %v1553_v2 = vmul.f32 %v1489_v10, %v918_v49  ;;  %v920_v23 = vpop.f32.mrb[35].mxu1  ;;  %1808 = vmatmul.mubr.f32.vlgmr.msra.gmra.mrb[32].mxu0 %v1551_v48  ;;  %v2891_v34 = vpop.eup %2890  ;;  %v2512_v48 = vmul.f32 -1.442695, %v4081_v61  ;;  %2912 = vrcp.f32 %v1307_v57 }
 0x1bd   : > { %v1554_v37 = vmul.f32 %v1490_v3, %v920_v23  ;;  %v2893_v9 = vpop.eup %2892  ;;  %2914 = vpow2.f32 %v2491_v14  ;;  %v1493_v36 = vmul.f32 %v2891_v34, %v4083_v13  ;;  %v1328_v23 = vadd.f32 1.0, %v4192_v25 }
 0x1be   : > { %v2895_v32 = vpop.eup %2894  ;;  %2916 = vrcp.f32 %v1308_v60  ;;  %v1494_v38 = vmul.f32 %v2893_v9, %v4087_v19  ;;  %v1329_v14 = vadd.f32 1.0, %v2879_v0  ;;  %v2492_v60 = vmul.f32 -1.442695, %v4136_v27 }
 0x1bf   : > { %v924_v20 = vpop.f32.mrb[36].mxu1  ;;  %1813 = vmatprep.mubr.f32.mxu0 %v1554_v37  ;;  %v2897_v3 = vpop.eup %2896  ;;  %v1309_v1 = vadd.f32 1.0, %v2895_v32  ;;  %2918 = vpow2.f32 %v2512_v48 }
 0x1c0   : > { %v1555_v58 = vmul.f32 %v1491_v45, %v924_v20  ;;  %v926_v11 = vpop.f32.mrb[37].mxu1  ;;  %1814 = vmatmul.mubr.f32.gmra.mrb[34].mxu0 %v1553_v2  ;;  %v2899_v30 = vpop.eup %2898  ;;  %v1310_v62 = vadd.f32 1.0, %v2897_v3  ;;  %v2493_v20 = vmul.f32 -1.442695, %v4141_v24 }
 0x1c1   : > { %v1556_v10 = vmul.f32 %v1492_v17, %v926_v11  ;;  %v2901_v47 = vpop.eup %2900  ;;  %2920 = vrcp.f32 %v1309_v1  ;;  %v1495_v45 = vmul.f32 %v2899_v30, %v4091_v28  ;;  %v2513_v28 = vmul.f32 -1.442695, %v4085_v18 }
 0x1c2   : > { %v2903_v57 = vpop.eup %2902  ;;  %2922 = vrcp.f32 %v1310_v62  ;;  %v1496_v19 = vmul.f32 %v2901_v47, %v4095_v39 }
 0x1c3   : > { %v930_v49 = vpop.f32.mrb[38].mxu1  ;;  %1819 = vmatprep.mubr.f32.mxu0 %v1556_v10  ;;  %v2905_v37 = vpop.eup %2904  ;;  %2924 = vrcp.f32 %v1327_v33  ;;  %v1330_v10 = vadd.f32 1.0, %v2889_v59  ;;  %v2494_v33 = vmul.f32 -1.442695, %v4146_v55 }
 0x1c4   : > { %v1557_v2 = vmul.f32 %v1493_v36, %v930_v49  ;;  %v932_v22 = vpop.f32.mrb[39].mxu1  ;;  %1820 = vmatmul.mubr.f32.gmra.mrb[36].mxu0 %v1555_v58  ;;  %v2907_v41 = vpop.eup %2906  ;;  %2926 = vrcp.f32 %v1328_v23  ;;  %v1497_v39 = vmul.f32 %v2905_v37, %v4099_v35  ;;  %v2495_v49 = vmul.f32 -1.442695, %v4151_v12 }
 0x1c5   : > { %v1558_v13 = vmul.f32 %v1494_v38, %v932_v22  ;;  %v2909_v25 = vpop.eup %2908  ;;  %v1311_v17 = vadd.f32 1.0, %v2907_v41  ;;  %2928 = vrcp.f32 %v1329_v14  ;;  %v1331_v23 = vadd.f32 1.0, %v2903_v57 }
 0x1c6   : > { %v2911_v48 = vpop.eup %2910  ;;  %v1498_v3 = vmul.f32 %v2909_v25, %v4103_v50  ;;  %v2514_v37 = vmul.f32 -1.442695, %v4089_v21  ;;  %v2515_v57 = vmul.f32 -1.442695, %v4093_v31 }
 0x1c7   : > { %v936_v34 = vpop.f32.mrb[40].mxu1  ;;  %1825 = vmatprep.mubr.f32.mxu0 %v1558_v13  ;;  %v2913_v11 = vpop.eup %2912  ;;  %2930 = vrcp.f32 %v1311_v17 }
 0x1c8   : > { %v1559_v0 = vmul.f32 %v1495_v45, %v936_v34  ;;  %v938_v9 = vpop.f32.mrb[41].mxu1  ;;  %1826 = vmatmul.mubr.f32.gmra.mrb[38].mxu0 %v1557_v2  ;;  %v2915_v32 = vpop.eup %2914  ;;  %2932 = vpow2.f32 %v2492_v60  ;;  %v1499_v59 = vmul.f32 %v2913_v11, %v4107_v46  ;;  %v1332_v2 = vadd.f32 1.0, %v2911_v48 }
 0x1c9   : > { %v1560_v58 = vmul.f32 %v1496_v19, %v938_v9  ;;  %v2917_v1 = vpop.eup %2916  ;;  %v1312_v30 = vadd.f32 1.0, %v2915_v32  ;;  %2934 = vpow2.f32 %v2493_v20  ;;  %v2496_v34 = vmul.f32 -1.442695, %v4157_v42 }
 0x1ca   : > { %2936 = vpow2.f32 %v2513_v28  ;;  %v2919_v47 = vpop.eup %2918  ;;  %v1500_v22 = vmul.f32 %v2917_v1, %v4111_v53  ;;  %v2497_v20 = vmul.f32 -1.442695, %v4163_v52 }
 0x1cb   : > { %v942_v36 = vpop.f32.mrb[42].mxu1  ;;  %1831 = vmatprep.mubr.f32.mxu0 %v1560_v58  ;;  %2938 = vrcp.f32 %v1312_v30  ;;  %v2921_v50 = vpop.eup %2920 }
 0x1cc   : > { %v1561_v38 = vmul.f32 %v1497_v39, %v942_v36  ;;  %v944_v62 = vpop.f32.mrb[43].mxu1  ;;  %1832 = vmatmul.mubr.f32.gmra.mrb[40].mxu0 %v1559_v0  ;;  %2940 = vrcp.f32 %v1330_v10  ;;  %v2923_v13 = vpop.eup %2922  ;;  %v1501_v53 = vmul.f32 %v2921_v50, %v4116_v6  ;;  %v1333_v39 = vadd.f32 1.0, %v2919_v47 }
 0x1cd   : > { %v1562_v35 = vmul.f32 %v1498_v3, %v944_v62  ;;  %2942 = vpow2.f32 %v2494_v33  ;;  %v4236_v19 = vpop.eup %2924  ;;  %v1502_v17 = vmul.f32 %v2923_v13, %v4120_v16  ;;  %v2516_v16 = vmul.f32 -1.442695, %v4097_v26 }
 0x1ce   : > { %2944 = vpow2.f32 %v2495_v49  ;;  %v4239_v60 = vpop.eup %2926  ;;  %v2517_v33 = vmul.f32 -1.442695, %v4101_v43 }
 0x1cf   : > { %v948_v14 = vpop.f32.mrb[44].mxu1  ;;  %1837 = vmatprep.mubr.f32.mxu0 %v1562_v35  ;;  %2946 = vrcp.f32 %v1331_v23  ;;  %v4243_v25 = vpop.eup %2928 }
 0x1d0   : > { %v1563_v45 = vmul.f32 %v1499_v59, %v948_v14  ;;  %v950_v41 = vpop.f32.mrb[45].mxu1  ;;  %1838 = vmatmul.mubr.f32.gmra.mrb[42].mxu0 %v1561_v38  ;;  %2948 = vrcp.f32 %v1332_v2  ;;  %v2518_v14 = vmul.f32 -1.442695, %v4105_v40 }
 0x1d1   : > { %v1564_v46 = vmul.f32 %v1500_v22, %v950_v41  ;;  %v2931_v9 = vpop.eup %2930  ;;  %2950 = vpow2.f32 %v2514_v37 }
 0x1d2   : > { %v2933_v58 = vpop.eup %2932  ;;  %2952 = vpow2.f32 %v2515_v57  ;;  %v1503_v32 = vmul.f32 %v2931_v9, %v4126_v51  ;;  %v2498_v57 = vmul.f32 -1.442695, %v4168_v4  ;;  %v2499_v9 = vmul.f32 -1.442695, %v4173_v15 }
 0x1d3   : > { %v954_v0 = vpop.f32.mrb[46].mxu1  ;;  %1843 = vmatprep.mubr.f32.mxu0 %v1564_v46  ;;  %v2935_v6 = vpop.eup %2934  ;;  %v1313_v10 = vadd.f32 1.0, %v2933_v58  ;;  %2954 = vpow2.f32 %v2496_v34 }
 0x1d4   : > { %v1565_v48 = vmul.f32 %v1501_v53, %v954_v0  ;;  %v956_v28 = vpop.f32.mrb[47].mxu1  ;;  %1844 = vmatmul.mubr.f32.gmra.mrb[44].mxu0 %v1563_v45  ;;  %v2937_v3 = vpop.eup %2936  ;;  %v1314_v36 = vadd.f32 1.0, %v2935_v6  ;;  %2956 = vpow2.f32 %v2497_v20 }
 0x1d5   : > { %v1566_v11 = vmul.f32 %v1502_v17, %v956_v28  ;;  %v2939_v30 = vpop.eup %2938  ;;  %2958 = vrcp.f32 %v1313_v10  ;;  %v1334_v23 = vadd.f32 1.0, %v2937_v3  ;;  %v2520_v3 = vmul.f32 -1.442695, %v4114_v63 }
 0x1d6   : > { %v4250_v49 = vpop.eup %2940  ;;  %v1504_v51 = vmul.f32 %v2939_v30, %v4131_v56  ;;  %2960 = vrcp.f32 %v1314_v36  ;;  %v2519_v56 = vmul.f32 -1.442695, %v4109_v54  ;;  %v2500_v30 = vmul.f32 -1.442695, %v4178_v5 }
 0x1d7   : > { %v960_v1 = vpop.f32.mrb[48].mxu1  ;;  %1849 = vmatprep.mubr.f32.mxu0 %v1566_v11  ;;  %v2943_v35 = vpop.eup %2942  ;;  %2962 = vrcp.f32 %v1333_v39 }
 0x1d8   : > { %v1567_v38 = vmul.f32 %v1503_v32, %v960_v1  ;;  %v962_v62 = vpop.f32.mrb[49].mxu1  ;;  %1850 = vmatmul.mubr.f32.gmra.mrb[46].mxu0 %v1565_v48  ;;  %v2945_v47 = vpop.eup %2944  ;;  %2964 = vpow2.f32 %v2516_v16  ;;  %v1315_v59 = vadd.f32 1.0, %v2943_v35  ;;  %v2502_v35 = vmul.f32 -1.442695, %v4190_v7 }
 0x1d9   : > { %v1568_v50 = vmul.f32 %v1504_v51, %v962_v62  ;;  %v4253_v22 = vpop.eup %2946  ;;  %2966 = vpow2.f32 %v2517_v33  ;;  %v1316_v13 = vadd.f32 1.0, %v2945_v47  ;;  %v2501_v62 = vmul.f32 -1.442695, %v4182_v29 }
 0x1da   : > { %v4256_v45 = vpop.eup %2948  ;;  %2968 = vrcp.f32 %v1315_v59  ;;  %v4649_v59 = vld [vmem:[#allocation30_spill] sm:$0xff] }
 0x1db   : > { %v966_v2 = vpop.f32.mrb[50].mxu1  ;;  %1855 = vmatprep.mubr.f32.mxu0 %v1568_v50  ;;  %v2951_v41 = vpop.eup %2950  ;;  %2970 = vrcp.f32 %v1316_v13  ;;  %v2503_v50 = vmul.f32 -1.442695, %v4649_v59  ;;  %v4650_v13 = vld [vmem:[#allocation15_spill] sm:$0xff] }
 0x1dc   : > { %v968_v37 = vpop.f32.mrb[51].mxu1  ;;  %1856 = vmatmul.mubr.f32.gmra.mrb[48].mxu0 %v1567_v38  ;;  %v2953_v46 = vpop.eup %2952  ;;  %2972 = vrcp.f32 %v1334_v23  ;;  %v1335_v28 = vadd.f32 1.0, %v2951_v41 }
 0x1dd   : > { %v2955_v34 = vpop.eup %2954  ;;  %2974 = vpow2.f32 %v2518_v14  ;;  %v1336_v6 = vadd.f32 1.0, %v2953_v46 }
 0x1de   : > { %v2957_v20 = vpop.eup %2956  ;;  %2976 = vpow2.f32 %v2519_v56  ;;  %v1317_v0 = vadd.f32 1.0, %v2955_v34  ;;  %v2521_v56 = vmul.f32 -1.442695, %v4650_v13 }
 0x1df   : > { %v972_v53 = vpop.f32.mrb[52].mxu1  ;;  %v2959_v48 = vpop.eup %2958  ;;  %v1318_v58 = vadd.f32 1.0, %v2957_v20  ;;  %2978 = vpow2.f32 %v2498_v57  ;;  %v4651_v57 = vld [vmem:[#allocation32_spill] sm:$0xff] }
 0x1e0   : > { %v974_v17 = vpop.f32.mrb[53].mxu1  ;;  %v2961_v11 = vpop.eup %2960  ;;  %v1505_v39 = vmul.f32 %v2959_v48, %v4136_v27  ;;  %2980 = vrcp.f32 %v1317_v0  ;;  %v2504_v46 = vmul.f32 -1.442695, %v4651_v57  ;;  %v4652_v48 = vld [vmem:[#allocation34_spill] sm:$0xff] }
 0x1e1   : > { %v4262_v10 = vpop.eup %2962  ;;  %v1506_v16 = vmul.f32 %v2961_v11, %v4141_v24  ;;  %2982 = vrcp.f32 %v1318_v58 }
 0x1e2   : > { %v2965_v1 = vpop.eup %2964  ;;  %2984 = vpow2.f32 %v2499_v9  ;;  %v1569_v33 = vmul.f32 %v1505_v39, %v966_v2 }
 0x1e3   : > { %v978_v32 = vpop.f32.mrb[54].mxu1  ;;  %v2967_v38 = vpop.eup %2966  ;;  %2986 = vrcp.f32 %v1335_v28  ;;  %v1570_v27 = vmul.f32 %v1506_v16, %v968_v37  ;;  %v2505_v28 = vmul.f32 -1.442695, %v4652_v48  ;;  %v1337_v11 = vadd.f32 1.0, %v2965_v1 }
 0x1e4   : > { %v980_v36 = vpop.f32.mrb[55].mxu1  ;;  %v2969_v51 = vpop.eup %2968  ;;  %2988 = vrcp.f32 %v1336_v6 }
 0x1e5   : > { %v2971_v23 = vpop.eup %2970  ;;  %2990 = vpow2.f32 %v2520_v3  ;;  %v1507_v24 = vmul.f32 %v2969_v51, %v4146_v55  ;;  %1861 = vmatprep.mubr.f32.mxu0 %v1570_v27 }
 0x1e6   : > { %v4275_v2 = vpop.eup %2972  ;;  %v1508_v37 = vmul.f32 %v2971_v23, %v4151_v12  ;;  %2992 = vpow2.f32 %v2500_v30  ;;  %1862 = vmatmul.mubr.f32.gmra.mrb[50].mxu0 %v1569_v33 }
 0x1e7   : > { %v4269_v47 = vpop.f32.mrb[56].mxu1  ;;  %v4279_v41 = vpop.eup %2974  ;;  %2994 = vpow2.f32 %v2501_v62  ;;  %v1571_v34 = vmul.f32 %v1507_v24, %v972_v53  ;;  %v4653_v62 = vld [vmem:[#allocation16_spill] sm:$0xff] }
 0x1e8   : > { %v4273_v14 = vpop.f32.mrb[57].mxu1  ;;  %v4282_v55 = vpop.eup %2976  ;;  %2996 = vpow2.f32 %v2502_v35  ;;  %v1572_v20 = vmul.f32 %v1508_v37, %v974_v17  ;;  %v1338_v17 = vadd.f32 1.0, %v2967_v38  ;;  %v2522_v27 = vmul.f32 -1.442695, %v4653_v62 }
 0x1e9   : > { %v2979_v9 = vpop.eup %2978  ;;  %2998 = vpow2.f32 %v2503_v50 }
 0x1ea   : > { %v2981_v12 = vpop.eup %2980  ;;  %3000 = vpow2.f32 %v2521_v56  ;;  %v1319_v6 = vadd.f32 1.0, %v2979_v9  ;;  %1867 = vmatprep.mubr.f32.mxu0 %v1572_v20 }
 0x1eb   : > { %v4284_v0 = vpop.f32.mrb[58].mxu1  ;;  %v2983_v39 = vpop.eup %2982  ;;  %v1509_v53 = vmul.f32 %v2981_v12, %v4157_v42  ;;  %3002 = vpow2.f32 %v2504_v46  ;;  %1868 = vmatmul.mubr.f32.gmra.mrb[52].mxu0 %v1571_v34  ;;  %v4654_v42 = vld [vmem:[#allocation17_spill] sm:$0xff]  ;;  %v4656_v12 = vld [vmem:[#allocation18_spill] sm:$0xff] }
 0x1ec   : > { %v4287_v58 = vpop.f32.mrb[59].mxu1  ;;  %v2985_v3 = vpop.eup %2984  ;;  %v1510_v16 = vmul.f32 %v2983_v39, %v4163_v52  ;;  %3004 = vrcp.f32 %v1319_v6  ;;  %v2523_v24 = vmul.f32 -1.442695, %v4654_v42 }
 0x1ed   : > { %v4293_v33 = vpop.eup %2986  ;;  %v1320_v1 = vadd.f32 1.0, %v2985_v3  ;;  %3006 = vpow2.f32 %v2505_v28  ;;  %v1573_v51 = vmul.f32 %v1509_v53, %v978_v32  ;;  %v4655_v28 = vld [vmem:[#allocation11_spill] sm:$0xff]  ;;  %v4657_v53 = vld [vmem:[#allocation12_spill] sm:$0xff] }
 0x1ee   : > { %v4298_v23 = vpop.eup %2988  ;;  %3008 = vrcp.f32 %v1337_v11  ;;  %v1574_v38 = vmul.f32 %v1510_v16, %v980_v36  ;;  %v1519_v36 = vmul.f32 %v4236_v19, %v4655_v28  ;;  %v2524_v11 = vmul.f32 -1.442695, %v4656_v12 }
 0x1ef   : > { %v4291_v30 = vpop.f32.mrb[60].mxu1  ;;  %v4301_v50 = vpop.eup %2990  ;;  %3010 = vrcp.f32 %v1320_v1  ;;  %v1520_v3 = vmul.f32 %v4239_v60, %v4657_v53  ;;  %v4658_v1 = vld [vmem:[#allocation19_spill] sm:$0xff]  ;;  %v4660_v60 = vld [vmem:[#allocation20_spill] sm:$0xff] }
 0x1f0   : > { %v4296_v35 = vpop.f32.mrb[61].mxu1  ;;  %v2993_v52 = vpop.eup %2992  ;;  %3012 = vrcp.f32 %v1338_v17  ;;  %1873 = vmatprep.mubr.f32.mxu0 %v1574_v38 }
 0x1f1   : > { %v2995_v37 = vpop.eup %2994  ;;  %3014 = vpow2.f32 %v2522_v27  ;;  %v1321_v46 = vadd.f32 1.0, %v2993_v52  ;;  %1874 = vmatmul.mubr.f32.gmra.mrb[54].mxu0 %v1573_v51  ;;  %v2525_v51 = vmul.f32 -1.442695, %v4658_v1 }
 0x1f2   : > { %v2997_v34 = vpop.eup %2996  ;;  %3016 = vpow2.f32 %v2523_v24  ;;  %v1322_v20 = vadd.f32 1.0, %v2995_v37 }
 0x1f3   : > { %v4303_v56 = vpop.f32.mrb[62].mxu1  ;;  %v2999_v9 = vpop.eup %2998  ;;  %3018 = vrcp.f32 %v1321_v46  ;;  %v1323_v6 = vadd.f32 1.0, %v2997_v34  ;;  %v4659_v34 = vld [vmem:[#allocation13_spill] sm:$0xff] }
 0x1f4   : > { %v4305_v32 = vpop.f32.mrb[63].mxu1  ;;  %v3001_v39 = vpop.eup %3000  ;;  %3020 = vrcp.f32 %v1322_v20  ;;  %v1324_v17 = vadd.f32 1.0, %v2999_v9  ;;  %v1521_v28 = vmul.f32 %v4243_v25, %v4659_v34  ;;  %v2526_v20 = vmul.f32 -1.442695, %v4660_v60 }
 0x1f5   : > { %v3003_v27 = vpop.eup %3002  ;;  %3022 = vrcp.f32 %v1323_v6  ;;  %v4661_v6 = vld [vmem:[#allocation14_spill] sm:$0xff] }
 0x1f6   : > { %v3005_v52 = vpop.eup %3004  ;;  %3024 = vrcp.f32 %v1324_v17  ;;  %v1325_v19 = vadd.f32 1.0, %v3003_v27 }
 0x1f7   : > { %v1008_v16 = vpop.f32.mrb[64].mxu1  ;;  %v3007_v46 = vpop.eup %3006  ;;  %3026 = vpow2.f32 %v2524_v11  ;;  %v1511_v9 = vmul.f32 %v3005_v52, %v4168_v4  ;;  %v4662_v52 = vld [vmem:[#allocation21_spill] sm:$0xff] }
 0x1f8   : > { %v4313_v24 = vmul.f32 %v1519_v36, %v1008_v16  ;;  %v1010_v38 = vpop.f32.mrb[65].mxu1  ;;  %v4321_v53 = vpop.eup %3008  ;;  %v1522_v36 = vmul.f32 %v4250_v49, %v4661_v6  ;;  %v1339_v16 = vadd.f32 1.0, %v4279_v41  ;;  %3028 = vrcp.f32 %v1325_v19 }
 0x1f9   : > { %v4315_v37 = vmul.f32 %v1520_v3, %v1010_v38  ;;  %v1326_v17 = vadd.f32 1.0, %v3007_v46  ;;  %v3011_v27 = vpop.eup %3010  ;;  %v1340_v38 = vadd.f32 1.0, %v4282_v55  ;;  %3030 = vpow2.f32 %v2525_v51  ;;  %v4663_v55 = vld [vmem:[#allocation22_spill] sm:$0xff] }
 0x1fa   : > { %v1575_v25 = vmul.f32 %v1511_v9, %v4269_v47  ;;  %v4330_v4 = vpop.eup %3012  ;;  %v2527_v60 = vmul.f32 -1.442695, %v4662_v52  ;;  %v1512_v49 = vmul.f32 %v3011_v27, %v4173_v15  ;;  %v1523_v46 = vmul.f32 %v4253_v22, %v4073_v8  ;;  %v4665_v27 = vld [vmem:[#allocation24_spill] sm:$0xff] }
 0x1fb   : > { %v1014_v3 = vpop.f32.mrb[66].mxu1  ;;  %3032 = vrcp.f32 %v1326_v17  ;;  %v3015_v19 = vpop.eup %3014  ;;  %v2528_v51 = vmul.f32 -1.442695, %v4663_v55  ;;  %v1525_v9 = vmul.f32 %v4262_v10, %v4081_v61  ;;  %v1526_v17 = vmul.f32 %v4275_v2, %v4085_v18 }
 0x1fc   : > { %v4328_v11 = vmul.f32 %v1521_v28, %v1014_v3  ;;  %v1016_v34 = vpop.f32.mrb[67].mxu1  ;;  %3034 = vpow2.f32 %v2526_v20  ;;  %v3017_v47 = vpop.eup %3016  ;;  %v1524_v28 = vmul.f32 %v4256_v45, %v4077_v44  ;;  %v1576_v15 = vmul.f32 %v1512_v49, %v4273_v14  ;;  %v4664_v44 = vld [vmem:[#allocation23_spill] sm:$0xff] }
 0x1fd   : > { %v4334_v41 = vmul.f32 %v1522_v36, %v1016_v34  ;;  %3036 = vrcp.f32 %v1339_v16  ;;  %v3019_v36 = vpop.eup %3018  ;;  %v1341_v8 = vadd.f32 1.0, %v4301_v50  ;;  %v2529_v45 = vmul.f32 -1.442695, %v4664_v44  ;;  %v4666_v34 = vld [vmem:[#allocation25_spill] sm:$0xff] }
 0x1fe   : > { %3038 = vrcp.f32 %v1340_v38  ;;  %v3021_v3 = vpop.eup %3020  ;;  %v1513_v61 = vmul.f32 %v3019_v36, %v4178_v5  ;;  %1879 = vmatprep.mubr.f32.mxu0 %v1576_v15  ;;  %v1342_v16 = vadd.f32 1.0, %v3001_v39  ;;  %v2530_v18 = vmul.f32 -1.442695, %v4665_v27 }
 0x1ff   : > { %v1020_v6 = vpop.f32.mrb[68].mxu1  ;;  %3040 = vpow2.f32 %v2527_v60  ;;  %v3023_v14 = vpop.eup %3022  ;;  %v1514_v2 = vmul.f32 %v3021_v3, %v4182_v29  ;;  %1880 = vmatmul.mubr.f32.gmra.mrb[56].mxu0 %v1575_v25  ;;  %v1343_v38 = vadd.f32 1.0, %v3015_v19  ;;  %v2531_v49 = vmul.f32 -1.442695, %v4666_v34 }
 0x200   : > { %v4347_v22 = vmul.f32 %v1523_v46, %v1020_v6  ;;  %v1022_v20 = vpop.f32.mrb[69].mxu1  ;;  %3042 = vpow2.f32 %v2528_v51  ;;  %v3025_v50 = vpop.eup %3024  ;;  %v1515_v60 = vmul.f32 %v3023_v14, %v4190_v7  ;;  %v1577_v46 = vmul.f32 %v1513_v61, %v4284_v0  ;;  %v4668_v61 = vld [vmem:[#allocation27_spill] sm:$0xff] }
 0x201   : > { %v4351_v10 = vmul.f32 %v1524_v28, %v1022_v20  ;;  %v3027_v15 = vpop.eup %3026  ;;  %3044 = vrcp.f32 %v1341_v8  ;;  %v1516_v28 = vmul.f32 %v3025_v50, %v4649_v59  ;;  %v1578_v39 = vmul.f32 %v1514_v2, %v4287_v58 }
 0x202   : > { %v3029_v29 = vpop.eup %3028  ;;  %v1527_v25 = vmul.f32 %v4293_v33, %v4089_v21  ;;  %3046 = vpow2.f32 %v2529_v45  ;;  %v1579_v19 = vmul.f32 %v1515_v60, %v4291_v30  ;;  %v1344_v36 = vadd.f32 1.0, %v3017_v47  ;;  %v4667_v21 = vld [vmem:[#allocation26_spill] sm:$0xff]  ;;  %v4669_v60 = vld [vmem:[#allocation28_spill] sm:$0xff] }
 0x203   : > { %v1026_v5 = vpop.f32.mrb[70].mxu1  ;;  %v3031_v0 = vpop.eup %3030  ;;  %3048 = vrcp.f32 %v1342_v16  ;;  %v1517_v8 = vmul.f32 %v3029_v29, %v4651_v57  ;;  %1885 = vmatprep.mubr.f32.mxu0 %v1578_v39  ;;  %v1580_v59 = vmul.f32 %v1516_v28, %v4296_v35  ;;  %v1345_v20 = vadd.f32 1.0, %v3027_v15 }
 0x204   : > { %v4360_v51 = vmul.f32 %v1525_v9, %v1026_v5  ;;  %v1028_v6 = vpop.f32.mrb[71].mxu1  ;;  %v1528_v9 = vmul.f32 %v4298_v23, %v4093_v31  ;;  %3050 = vrcp.f32 %v1343_v38  ;;  %v2532_v33 = vmul.f32 -1.442695, %v4667_v21  ;;  %1886 = vmatmul.mubr.f32.gmra.mrb[58].mxu0 %v1577_v46 }
 0x205   : > { %v4365_v7 = vmul.f32 %v1526_v17, %v1028_v6  ;;  %v3033_v58 = vpop.eup %3032  ;;  %3052 = vpow2.f32 %v2530_v18  ;;  %v1581_v47 = vmul.f32 %v1517_v8, %v4303_v56  ;;  %1891 = vmatprep.mubr.f32.mxu0 %v1580_v59  ;;  %v2533_v31 = vmul.f32 -1.442695, %v4668_v61 }
 0x206   : > { %v3035_v17 = vpop.eup %3034  ;;  %v1518_v3 = vmul.f32 %v3033_v58, %v4652_v48  ;;  %3054 = vpow2.f32 %v2531_v49  ;;  %v1529_v16 = vmul.f32 %v4321_v53, %v4097_v26  ;;  %v1346_v18 = vadd.f32 1.0, %v3031_v0  ;;  %v4670_v53 = vld [vmem:[#allocation29_spill] sm:$0xff]  ;;  %v4671_v0 = vld [vmem:[#allocation31_spill] sm:$0xff] }
 0x207   : > { %v1032_v30 = vpop.f32.mrb[72].mxu1  ;;  %v3037_v45 = vpop.eup %3036  ;;  %3056 = vrcp.f32 %v1344_v36  ;;  %v1530_v56 = vmul.f32 %v4330_v4, %v4101_v43  ;;  %v1347_v50 = vadd.f32 1.0, %v3035_v17  ;;  %v2534_v46 = vmul.f32 -1.442695, %v4669_v60 }
 0x208   : > { %v4374_v57 = vmul.f32 %v1527_v25, %v1032_v30  ;;  %v1034_v35 = vpop.f32.mrb[73].mxu1  ;;  %v3039_v14 = vpop.eup %3038  ;;  %v1582_v48 = vmul.f32 %v1518_v3, %v4305_v32  ;;  %3058 = vrcp.f32 %v1345_v20  ;;  %1892 = vmatmul.mubr.f32.gmra.mrb[60].mxu0 %v1579_v19  ;;  %v2535_v15 = vmul.f32 -1.442695, %v4670_v53 }
 0x209   : > { %v4377_v23 = vmul.f32 %v1528_v9, %v1034_v35  ;;  %v3041_v2 = vpop.eup %3040  ;;  %3060 = vpow2.f32 %v2532_v33  ;;  %v1531_v43 = vmul.f32 %v3037_v45, %v4105_v40  ;;  %v1532_v6 = vmul.f32 %v3039_v14, %v4109_v54  ;;  %v4672_v40 = vld [vmem:[#allocation33_spill] sm:$0xff] }
 0x20a   : > { %v3043_v49 = vpop.eup %3042  ;;  %1897 = vmatprep.mubr.f32.mxu0 %v1582_v48  ;;  %3062 = vpow2.f32 %v2533_v31  ;;  %v1348_v4 = vadd.f32 1.0, %v3041_v2  ;;  %v2536_v36 = vmul.f32 -1.442695, %v4671_v0  ;;  %v2537_v9 = vmul.f32 -1.442695, %v4672_v40 }
 0x20b   : > { %v1038_v38 = vpop.f32.mrb[74].mxu1  ;;  %v3045_v28 = vpop.eup %3044  ;;  %3064 = vrcp.f32 %v1346_v18  ;;  %v1349_v29 = vadd.f32 1.0, %v3043_v49 }
 0x20c   : > { %v4385_v5 = vmul.f32 %v1529_v16, %v1038_v38  ;;  %v1040_v26 = vpop.f32.mrb[75].mxu1  ;;  %v3047_v39 = vpop.eup %3046  ;;  %3066 = vrcp.f32 %v1347_v50  ;;  %1898 = vmatmul.mubr.f32.gmra.mrb[62].mxu0 %v1581_v47  ;;  %v1533_v33 = vmul.f32 %v3045_v28, %v4114_v63 }
 0x20d   : > { %v4388_v32 = vmul.f32 %v1530_v56, %v1040_v26  ;;  %v3049_v19 = vpop.eup %3048  ;;  %3068 = vpow2.f32 %v2534_v46  ;;  %1903 = vmatprep.mubr.f32.mxu0 %v4315_v37  ;;  %v1350_v30 = vadd.f32 1.0, %v3047_v39 }
 0x20e   : > { %v3051_v58 = vpop.eup %3050  ;;  %3070 = vpow2.f32 %v2535_v15  ;;  %v1534_v3 = vmul.f32 %v3049_v19, %v4650_v13 }
 0x20f   : > { %v1044_v25 = vpop.f32.mrb[76].mxu1  ;;  %v3053_v54 = vpop.eup %3052  ;;  %3072 = vrcp.f32 %v1348_v4  ;;  %v1535_v18 = vmul.f32 %v3051_v58, %v4653_v62 }
 0x210   : > { %v4394_v8 = vmul.f32 %v1531_v43, %v1044_v25  ;;  %v1046_v59 = vpop.f32.mrb[77].mxu1  ;;  %v3055_v17 = vpop.eup %3054  ;;  %3074 = vrcp.f32 %v1349_v29  ;;  %1904 = vmatmul.mubr.f32.gmra.mrb[64].mxu0 %v4313_v24  ;;  %v1351_v14 = vadd.f32 1.0, %v3053_v54  ;;  %v4673_v25 = vld [vmem:[#allocation20_spill] sm:$0xff] }
 0x211   : > { %v4397_v20 = vmul.f32 %v1532_v6, %v1046_v59  ;;  %v3057_v47 = vpop.eup %3056  ;;  %3076 = vpow2.f32 %v2536_v36  ;;  %1909 = vmatprep.mubr.f32.mxu0 %v4334_v41  ;;  %v1352_v13 = vadd.f32 1.0, %v3055_v17 }
 0x212   : > { %v3059_v31 = vpop.eup %3058  ;;  %3078 = vpow2.f32 %v2537_v9  ;;  %v1536_v24 = vmul.f32 %v3057_v47, %v4654_v42 }
 0x213   : > { %v1050_v37 = vpop.f32.mrb[78].mxu1  ;;  %v3061_v16 = vpop.eup %3060  ;;  %3080 = vrcp.f32 %v1350_v30  ;;  %v1537_v26 = vmul.f32 %v3059_v31, %v4656_v12 }
 0x214   : > { %v4403_v35 = vmul.f32 %v1533_v33, %v1050_v37  ;;  %v1052_v45 = vpop.f32.mrb[79].mxu1  ;;  %v3063_v48 = vpop.eup %3062  ;;  %1910 = vmatmul.mubr.f32.gmra.mrb[66].mxu0 %v4328_v11  ;;  %3082 = vrcp.f32 %v1351_v14  ;;  %v1353_v49 = vadd.f32 1.0, %v3061_v16 }
 0x215   : > { %v4405_v63 = vmul.f32 %v1534_v3, %v1052_v45  ;;  %v3065_v41 = vpop.eup %3064  ;;  %1915 = vmatprep.mubr.f32.mxu0 %v4351_v10  ;;  %3084 = vrcp.f32 %v1352_v13  ;;  %v1354_v15 = vadd.f32 1.0, %v3063_v48 }
 0x216   : > { %v3067_v38 = vpop.eup %3066  ;;  %v1538_v11 = vmul.f32 %v3065_v41, %v4658_v1  ;;  %3086 = vrcp.f32 %v1353_v49 }
 0x217   : > { %v1056_v2 = vpop.f32.mrb[80].mxu1  ;;  %v3069_v62 = vpop.eup %3068  ;;  %v1539_v19 = vmul.f32 %v3067_v38, %v4673_v25  ;;  %3088 = vrcp.f32 %v1354_v15 }
 0x218   : > { %v4411_v56 = vmul.f32 %v1535_v18, %v1056_v2  ;;  %v1058_v50 = vpop.f32.mrb[81].mxu1  ;;  %v3071_v42 = vpop.eup %3070  ;;  %1916 = vmatmul.mubr.f32.gmra.mrb[68].mxu0 %v4347_v22  ;;  %v1355_v6 = vadd.f32 1.0, %v3069_v62 }
 0x219   : > { %v4413_v46 = vmul.f32 %v1536_v24, %v1058_v50  ;;  %v3073_v10 = vpop.eup %3072  ;;  %1921 = vmatprep.mubr.f32.mxu0 %v4365_v7  ;;  %v1356_v36 = vadd.f32 1.0, %v3071_v42 }
 0x21a   : > { %v3075_v39 = vpop.eup %3074  ;;  %v1540_v22 = vmul.f32 %v3073_v10, %v4662_v52  ;;  %3090 = vrcp.f32 %v1355_v6  ;;  %v1618_v10 = vld [vmem:[#allocation2 + $0x18] sm:$0xff] }
 0x21b   : > { %v1062_v28 = vpop.f32.mrb[82].mxu1  ;;  %v3077_v12 = vpop.eup %3076  ;;  %v1541_v30 = vmul.f32 %v3075_v39, %v4663_v55  ;;  %3092 = vrcp.f32 %v1356_v36 }
 0x21c   : > { %v4419_v43 = vmul.f32 %v1537_v26, %v1062_v28  ;;  %v1064_v4 = vpop.f32.mrb[83].mxu1  ;;  %v3079_v1 = vpop.eup %3078  ;;  %1922 = vmatmul.mubr.f32.gmra.mrb[70].mxu0 %v4360_v51  ;;  %v1357_v54 = vadd.f32 1.0, %v3077_v12  ;;  %v1617_v28 = vld [vmem:[#allocation2 + $0x10] sm:$0xff]  ;;  %v1620_v12 = vld [vmem:[#allocation2 + $0x28] sm:$0xff] }
 0x21d   : > { %v4421_v29 = vmul.f32 %v1538_v11, %v1064_v4  ;;  %v3081_v7 = vpop.eup %3080  ;;  %1927 = vmatprep.mubr.f32.mxu0 %v4377_v23  ;;  %v1358_v17 = vadd.f32 1.0, %v3079_v1 }
 0x21e   : > { %v3083_v3 = vpop.eup %3082  ;;  %v1542_v37 = vmul.f32 %v3081_v7, %v4664_v44  ;;  %3094 = vrcp.f32 %v1357_v54 }
 0x21f   : > { %v1068_v59 = vpop.f32.mrb[84].mxu1  ;;  %v3085_v51 = vpop.eup %3084  ;;  %v1543_v31 = vmul.f32 %v3083_v3, %v4665_v27  ;;  %3096 = vrcp.f32 %v1358_v17 }
 0x220   : > { %v1603_v58 = vmul.f32 %v1539_v19, %v1068_v59  ;;  %v1070_v9 = vpop.f32.mrb[85].mxu1  ;;  %1928 = vmatmul.mubr.f32.gmra.mrb[72].mxu0 %v4374_v57  ;;  %v3087_v14 = vpop.eup %3086  ;;  %v1544_v55 = vmul.f32 %v3085_v51, %v4666_v34  ;;  %v1622_v59 = vld [vmem:[#allocation2 + $0x38] sm:$0xff]  ;;  %v1625_v51 = vld [vmem:[#allocation2 + $0x50] sm:$0xff] }
 0x221   : > { %v1604_v33 = vmul.f32 %v1540_v22, %v1070_v9  ;;  %1933 = vmatprep.mubr.f32.mxu0 %v4388_v32  ;;  %v3089_v44 = vpop.eup %3088  ;;  %v1545_v32 = vmul.f32 %v3087_v14, %v4667_v21  ;;  %v1621_v22 = vld [vmem:[#allocation2 + $0x30] sm:$0xff] }
 0x222   : > { %v1546_v24 = vmul.f32 %v3089_v44, %v4668_v61 }
 0x223   : > { %v1074_v52 = vpop.f32.mrb[86].mxu1 }
 0x224   : > { %v1605_v47 = vmul.f32 %v1541_v30, %v1074_v52  ;;  %v1076_v23 = vpop.f32.mrb[87].mxu1  ;;  %1934 = vmatmul.mubr.f32.gmra.mrb[74].mxu0 %v4385_v5  ;;  %v3091_v48 = vpop.eup %3090  ;;  %v1624_v30 = vld [vmem:[#allocation2 + $0x48] sm:$0xff] }
 0x225   : > { %v1606_v45 = vmul.f32 %v1542_v37, %v1076_v23  ;;  %1939 = vmatprep.mubr.f32.mxu0 %v4397_v20  ;;  %v3093_v2 = vpop.eup %3092  ;;  %v1547_v50 = vmul.f32 %v3091_v48, %v4669_v60  ;;  %v1630_v48 = vld [vmem:[#allocation2 + $0x78] sm:$0xff] }
 0x226   : > { %v1548_v38 = vmul.f32 %v3093_v2, %v4670_v53 }
 0x227   : > { %v1080_v16 = vpop.f32.mrb[88].mxu1 }
 0x228   : > { %v1607_v57 = vmul.f32 %v1543_v31, %v1080_v16  ;;  %v1082_v18 = vpop.f32.mrb[89].mxu1  ;;  %1940 = vmatmul.mubr.f32.gmra.mrb[76].mxu0 %v4394_v8  ;;  %v3095_v20 = vpop.eup %3094  ;;  %v1628_v16 = vld [vmem:[#allocation2 + $0x68] sm:$0xff] }
 0x229   : > { %v1608_v13 = vmul.f32 %v1544_v55, %v1082_v18  ;;  %1945 = vmatprep.mubr.f32.mxu0 %v4405_v63  ;;  %v3097_v49 = vpop.eup %3096  ;;  %v1549_v26 = vmul.f32 %v3095_v20, %v4671_v0  ;;  %v1615_v0 = vld [vmem:[#allocation2] sm:$0xff] }
 0x22a   : > { %v1550_v63 = vmul.f32 %v3097_v49, %v4672_v40  ;;  %v1616_v40 = vld [vmem:[#allocation2 + $0x8] sm:$0xff]  ;;  %v1627_v55 = vld [vmem:[#allocation2 + $0x60] sm:$0xff]  ;;  %v1633_v49 = vld [vmem:[#allocation2 + $0x90] sm:$0xff] }
 0x22b   : > { %v1086_v27 = vpop.f32.mrb[90].mxu1 }
 0x22c   : > { %v1609_v34 = vmul.f32 %v1545_v32, %v1086_v27  ;;  %v1088_v5 = vpop.f32.mrb[91].mxu1  ;;  %1946 = vmatmul.mubr.f32.gmra.mrb[78].mxu0 %v4403_v35  ;;  %v1629_v32 = vld [vmem:[#allocation2 + $0x70] sm:$0xff] }
 0x22d   : > { %v1610_v41 = vmul.f32 %v1546_v24, %v1088_v5  ;;  %1951 = vmatprep.mubr.f32.mxu0 %v4413_v46  ;;  %v1631_v5 = vld [vmem:[#allocation2 + $0x80] sm:$0xff] }
 0x22f   : > { %v1092_v21 = vpop.f32.mrb[92].mxu1 }
 0x230   : > { %v1611_v61 = vmul.f32 %v1547_v50, %v1092_v21  ;;  %v1094_v8 = vpop.f32.mrb[93].mxu1  ;;  %1952 = vmatmul.mubr.f32.gmra.mrb[80].mxu0 %v4411_v56 }
 0x231   : > { %v1612_v62 = vmul.f32 %v1548_v38, %v1094_v8  ;;  %1957 = vmatprep.mubr.f32.mxu0 %v4421_v29  ;;  %v1619_v29 = vld [vmem:[#allocation2 + $0x20] sm:$0xff] }
 0x233   : > { %v1098_v15 = vpop.f32.mrb[94].mxu1 }
 0x234   : > { %v1613_v60 = vmul.f32 %v1549_v26, %v1098_v15  ;;  %v1100_v53 = vpop.f32.mrb[95].mxu1  ;;  %1958 = vmatmul.mubr.f32.gmra.mrb[82].mxu0 %v4419_v43  ;;  %v1635_v15 = vld [vmem:[#allocation2 + $0xa0] sm:$0xff] }
 0x235   : > { %v1614_v42 = vmul.f32 %v1550_v63, %v1100_v53  ;;  %1963 = vmatprep.mubr.f32.mxu0 %v1604_v33  ;;  %v1623_v33 = vld [vmem:[#allocation2 + $0x40] sm:$0xff] }
 0x238   : > { %1964 = vmatmul.mubr.f32.gmra.mrb[84].mxu0 %v1603_v58 }
 0x239   : > { %1969 = vmatprep.mubr.f32.mxu0 %v1606_v45 }
 0x23c   : > { %1970 = vmatmul.mubr.f32.gmra.mrb[86].mxu0 %v1605_v47  ;;  %v1626_v47 = vld [vmem:[#allocation2 + $0x58] sm:$0xff] }
 0x23d   : > { %1975 = vmatprep.mubr.f32.mxu0 %v1608_v13 }
 0x240   : > { %1976 = vmatmul.mubr.f32.gmra.mrb[88].mxu0 %v1607_v57 }
 0x241   : > { %1981 = vmatprep.mubr.f32.mxu0 %v1610_v41  ;;  %v1632_v41 = vld [vmem:[#allocation2 + $0x88] sm:$0xff] }
 0x244   : > { %1982 = vmatmul.mubr.f32.gmra.mrb[90].mxu0 %v1609_v34 }
 0x245   : > { %1987 = vmatprep.mubr.f32.mxu0 %v1612_v62 }
 0x248   : > { %1988 = vmatmul.mubr.f32.gmra.mrb[92].mxu0 %v1611_v61  ;;  %v1634_v61 = vld [vmem:[#allocation2 + $0x98] sm:$0xff] }
 0x249   : > { %1993 = vmatprep.mubr.f32.mxu0 %v1614_v42 }
 0x24c   : > { %1994 = vmatmul.mubr.f32.gmra.mrb[94].mxu0 %v1613_v60  ;;  %v1636_v60 = vld [vmem:[#allocation2 + $0xa8] sm:$0xff] }
 0x28f   : > { %v1809_v35 = vpop.f32.mrb[32].mxu0 }
 0x290   : > { %v2000_v56 = vadd.f32 %v1809_v35, %v1615_v0  ;;  %v1811_v46 = vpop.f32.mrb[33].mxu0  ;;  %v1637_v35 = vld [vmem:[#allocation2 + $0xb0] sm:$0xff] }
 0x291   : > { %v2001_v11 = vadd.f32 %v1811_v46, %v1616_v40 }
 0x292   : > { %2064 = vst [vmem:[#allocation2] sm:$0xff] %v2000_v56  ;;  %v1638_v56 = vld [vmem:[#allocation2 + $0xb8] sm:$0xff] }
 0x293   : > { %2065 = vst [vmem:[#allocation2 + $0x8] sm:$0xff] %v2001_v11  ;;  %v1815_v43 = vpop.f32.mrb[34].mxu0 }
 0x294   : > { %v2002_v4 = vadd.f32 %v1815_v43, %v1617_v28  ;;  %v1817_v39 = vpop.f32.mrb[35].mxu0  ;;  %v1639_v43 = vld [vmem:[#allocation2 + $0xc0] sm:$0xff] }
 0x295   : > { %v2003_v6 = vadd.f32 %v1817_v39, %v1618_v10 }
 0x296   : > { %2066 = vst [vmem:[#allocation2 + $0x10] sm:$0xff] %v2002_v4  ;;  %v1640_v4 = vld [vmem:[#allocation2 + $0xc8] sm:$0xff] }
 0x297   : > { %2067 = vst [vmem:[#allocation2 + $0x18] sm:$0xff] %v2003_v6  ;;  %v1821_v25 = vpop.f32.mrb[36].mxu0 }
 0x298   : > { %v2004_v19 = vadd.f32 %v1821_v25, %v1619_v29  ;;  %v1823_v36 = vpop.f32.mrb[37].mxu0  ;;  %v1641_v25 = vld [vmem:[#allocation2 + $0xd0] sm:$0xff] }
 0x299   : > { %v2005_v1 = vadd.f32 %v1823_v36, %v1620_v12 }
 0x29a   : > { %2068 = vst [vmem:[#allocation2 + $0x20] sm:$0xff] %v2004_v19  ;;  %v1642_v19 = vld [vmem:[#allocation2 + $0xd8] sm:$0xff] }
 0x29b   : > { %2069 = vst [vmem:[#allocation2 + $0x28] sm:$0xff] %v2005_v1  ;;  %v1827_v7 = vpop.f32.mrb[38].mxu0 }
 0x29c   : > { %v2006_v58 = vadd.f32 %v1827_v7, %v1621_v22  ;;  %v1829_v9 = vpop.f32.mrb[39].mxu0  ;;  %v1643_v7 = vld [vmem:[#allocation2 + $0xe0] sm:$0xff] }
 0x29d   : > { %v2007_v54 = vadd.f32 %v1829_v9, %v1622_v59 }
 0x29e   : > { %2070 = vst [vmem:[#allocation2 + $0x30] sm:$0xff] %v2006_v58  ;;  %v1644_v58 = vld [vmem:[#allocation2 + $0xe8] sm:$0xff] }
 0x29f   : > { %2071 = vst [vmem:[#allocation2 + $0x38] sm:$0xff] %v2007_v54  ;;  %v1833_v17 = vpop.f32.mrb[40].mxu0 }
 0x2a0   : > { %v2008_v3 = vadd.f32 %v1833_v17, %v1623_v33  ;;  %v1835_v37 = vpop.f32.mrb[41].mxu0  ;;  %v1645_v17 = vld [vmem:[#allocation2 + $0xf0] sm:$0xff] }
 0x2a1   : > { %v2009_v52 = vadd.f32 %v1835_v37, %v1624_v30 }
 0x2a2   : > { %2072 = vst [vmem:[#allocation2 + $0x40] sm:$0xff] %v2008_v3  ;;  %v1646_v3 = vld [vmem:[#allocation2 + $0xf8] sm:$0xff] }
 0x2a3   : > { %2073 = vst [vmem:[#allocation2 + $0x48] sm:$0xff] %v2009_v52  ;;  %v1839_v23 = vpop.f32.mrb[42].mxu0 }
 0x2a4   : > { %v2010_v45 = vadd.f32 %v1839_v23, %v1625_v51  ;;  %v1841_v31 = vpop.f32.mrb[43].mxu0  ;;  %v1647_v23 = vld [vmem:[#allocation2 + $0x100] sm:$0xff] }
 0x2a5   : > { %v2011_v14 = vadd.f32 %v1841_v31, %v1626_v47 }
 0x2a6   : > { %2074 = vst [vmem:[#allocation2 + $0x50] sm:$0xff] %v2010_v45  ;;  %v1648_v45 = vld [vmem:[#allocation2 + $0x108] sm:$0xff] }
 0x2a7   : > { %2075 = vst [vmem:[#allocation2 + $0x58] sm:$0xff] %v2011_v14  ;;  %v1845_v44 = vpop.f32.mrb[44].mxu0 }
 0x2a8   : > { %v2012_v57 = vadd.f32 %v1845_v44, %v1627_v55  ;;  %v1847_v18 = vpop.f32.mrb[45].mxu0  ;;  %v1649_v44 = vld [vmem:[#allocation2 + $0x110] sm:$0xff] }
 0x2a9   : > { %v2013_v13 = vadd.f32 %v1847_v18, %v1628_v16 }
 0x2aa   : > { %2076 = vst [vmem:[#allocation2 + $0x60] sm:$0xff] %v2012_v57  ;;  %v1650_v57 = vld [vmem:[#allocation2 + $0x118] sm:$0xff] }
 0x2ab   : > { %2077 = vst [vmem:[#allocation2 + $0x68] sm:$0xff] %v2013_v13  ;;  %v1851_v24 = vpop.f32.mrb[46].mxu0 }
 0x2ac   : > { %v2014_v27 = vadd.f32 %v1851_v24, %v1629_v32  ;;  %v1853_v2 = vpop.f32.mrb[47].mxu0  ;;  %v1651_v24 = vld [vmem:[#allocation2 + $0x120] sm:$0xff] }
 0x2ad   : > { %v2015_v34 = vadd.f32 %v1853_v2, %v1630_v48 }
 0x2ae   : > { %2078 = vst [vmem:[#allocation2 + $0x70] sm:$0xff] %v2014_v27  ;;  %v1652_v27 = vld [vmem:[#allocation2 + $0x128] sm:$0xff] }
 0x2af   : > { %2079 = vst [vmem:[#allocation2 + $0x78] sm:$0xff] %v2015_v34  ;;  %v1857_v50 = vpop.f32.mrb[48].mxu0 }
 0x2b0   : > { %v2016_v20 = vadd.f32 %v1857_v50, %v1631_v5  ;;  %v1859_v38 = vpop.f32.mrb[49].mxu0  ;;  %v1653_v50 = vld [vmem:[#allocation2 + $0x130] sm:$0xff] }
 0x2b1   : > { %v2017_v21 = vadd.f32 %v1859_v38, %v1632_v41 }
 0x2b2   : > { %2080 = vst [vmem:[#allocation2 + $0x80] sm:$0xff] %v2016_v20  ;;  %v1654_v20 = vld [vmem:[#allocation2 + $0x138] sm:$0xff] }
 0x2b3   : > { %2081 = vst [vmem:[#allocation2 + $0x88] sm:$0xff] %v2017_v21 }
 0x2b9   : > { %v1863_v8 = vpop.f32.mrb[50].mxu0 }
 0x2ba   : > { %v2018_v62 = vadd.f32 %v1863_v8, %v1633_v49  ;;  %v1865_v26 = vpop.f32.mrb[51].mxu0  ;;  %v1655_v8 = vld [vmem:[#allocation2 + $0x140] sm:$0xff] }
 0x2bb   : > { %v2019_v63 = vadd.f32 %v1865_v26, %v1634_v61 }
 0x2bc   : > { %2082 = vst [vmem:[#allocation2 + $0x90] sm:$0xff] %v2018_v62  ;;  %v1656_v62 = vld [vmem:[#allocation2 + $0x148] sm:$0xff] }
 0x2bd   : > { %2083 = vst [vmem:[#allocation2 + $0x98] sm:$0xff] %v2019_v63 }
 0x2be   : > { %v1869_v53 = vpop.f32.mrb[52].mxu0 }
 0x2bf   : > { %v2020_v42 = vadd.f32 %v1869_v53, %v1635_v15  ;;  %v1871_v0 = vpop.f32.mrb[53].mxu0  ;;  %v1657_v53 = vld [vmem:[#allocation2 + $0x150] sm:$0xff] }
 0x2c0   : > { %v2021_v40 = vadd.f32 %v1871_v0, %v1636_v60 }
 0x2c1   : > { %2084 = vst [vmem:[#allocation2 + $0xa0] sm:$0xff] %v2020_v42  ;;  %v1658_v42 = vld [vmem:[#allocation2 + $0x158] sm:$0xff] }
 0x2c2   : > { %2085 = vst [vmem:[#allocation2 + $0xa8] sm:$0xff] %v2021_v40 }
 0x2c4   : > { %v1875_v46 = vpop.f32.mrb[54].mxu0 }
 0x2c5   : > { %v2022_v11 = vadd.f32 %v1875_v46, %v1637_v35  ;;  %v1877_v28 = vpop.f32.mrb[55].mxu0  ;;  %v1659_v46 = vld [vmem:[#allocation2 + $0x160] sm:$0xff] }
 0x2c6   : > { %v2023_v10 = vadd.f32 %v1877_v28, %v1638_v56 }
 0x2c7   : > { %2086 = vst [vmem:[#allocation2 + $0xb0] sm:$0xff] %v2022_v11  ;;  %v1660_v11 = vld [vmem:[#allocation2 + $0x168] sm:$0xff] }
 0x2c8   : > { %2087 = vst [vmem:[#allocation2 + $0xb8] sm:$0xff] %v2023_v10 }
 0x2d2   : > { %v1881_v39 = vpop.f32.mrb[56].mxu0 }
 0x2d3   : > { %v2024_v6 = vadd.f32 %v1881_v39, %v1639_v43  ;;  %v1883_v29 = vpop.f32.mrb[57].mxu0  ;;  %v1661_v39 = vld [vmem:[#allocation2 + $0x170] sm:$0xff] }
 0x2d4   : > { %v2025_v12 = vadd.f32 %v1883_v29, %v1640_v4 }
 0x2d5   : > { %2088 = vst [vmem:[#allocation2 + $0xc0] sm:$0xff] %v2024_v6  ;;  %v1662_v6 = vld [vmem:[#allocation2 + $0x178] sm:$0xff] }
 0x2d6   : > { %2089 = vst [vmem:[#allocation2 + $0xc8] sm:$0xff] %v2025_v12 }
 0x2d7   : > { %v1887_v36 = vpop.f32.mrb[58].mxu0 }
 0x2d8   : > { %v2026_v1 = vadd.f32 %v1887_v36, %v1641_v25  ;;  %v1889_v22 = vpop.f32.mrb[59].mxu0  ;;  %v1663_v36 = vld [vmem:[#allocation2 + $0x180] sm:$0xff] }
 0x2d9   : > { %v2027_v59 = vadd.f32 %v1889_v22, %v1642_v19 }
 0x2da   : > { %2090 = vst [vmem:[#allocation2 + $0xd0] sm:$0xff] %v2026_v1  ;;  %v1664_v1 = vld [vmem:[#allocation2 + $0x188] sm:$0xff] }
 0x2db   : > { %2091 = vst [vmem:[#allocation2 + $0xd8] sm:$0xff] %v2027_v59  ;;  %v1893_v9 = vpop.f32.mrb[60].mxu0 }
 0x2dc   : > { %v2028_v54 = vadd.f32 %v1893_v9, %v1643_v7  ;;  %v1895_v33 = vpop.f32.mrb[61].mxu0  ;;  %v1665_v9 = vld [vmem:[#allocation2 + $0x190] sm:$0xff] }
 0x2dd   : > { %v2029_v30 = vadd.f32 %v1895_v33, %v1644_v58 }
 0x2de   : > { %2092 = vst [vmem:[#allocation2 + $0xe0] sm:$0xff] %v2028_v54  ;;  %v1666_v54 = vld [vmem:[#allocation2 + $0x198] sm:$0xff] }
 0x2df   : > { %2093 = vst [vmem:[#allocation2 + $0xe8] sm:$0xff] %v2029_v30  ;;  %v1899_v37 = vpop.f32.mrb[62].mxu0 }
 0x2e0   : > { %v2030_v52 = vadd.f32 %v1899_v37, %v1645_v17  ;;  %v1901_v51 = vpop.f32.mrb[63].mxu0  ;;  %v1667_v37 = vld [vmem:[#allocation2 + $0x1a0] sm:$0xff] }
 0x2e1   : > { %v2031_v47 = vadd.f32 %v1901_v51, %v1646_v3 }
 0x2e2   : > { %2094 = vst [vmem:[#allocation2 + $0xf0] sm:$0xff] %v2030_v52  ;;  %v1668_v52 = vld [vmem:[#allocation2 + $0x1a8] sm:$0xff] }
 0x2e3   : > { %2095 = vst [vmem:[#allocation2 + $0xf8] sm:$0xff] %v2031_v47  ;;  %v1905_v31 = vpop.f32.mrb[64].mxu0 }
 0x2e4   : > { %v2032_v14 = vadd.f32 %v1905_v31, %v1647_v23  ;;  %v1907_v55 = vpop.f32.mrb[65].mxu0  ;;  %v1669_v31 = vld [vmem:[#allocation2 + $0x1b0] sm:$0xff] }
 0x2e5   : > { %v2033_v16 = vadd.f32 %v1907_v55, %v1648_v45 }
 0x2e6   : > { %2096 = vst [vmem:[#allocation2 + $0x100] sm:$0xff] %v2032_v14  ;;  %v1670_v14 = vld [vmem:[#allocation2 + $0x1b8] sm:$0xff] }
 0x2e7   : > { %2097 = vst [vmem:[#allocation2 + $0x108] sm:$0xff] %v2033_v16  ;;  %v1911_v18 = vpop.f32.mrb[66].mxu0 }
 0x2e8   : > { %v2034_v13 = vadd.f32 %v1911_v18, %v1649_v44  ;;  %v1913_v32 = vpop.f32.mrb[67].mxu0  ;;  %v1671_v18 = vld [vmem:[#allocation2 + $0x1c0] sm:$0xff] }
 0x2e9   : > { %v2035_v48 = vadd.f32 %v1913_v32, %v1650_v57 }
 0x2ea   : > { %2098 = vst [vmem:[#allocation2 + $0x110] sm:$0xff] %v2034_v13  ;;  %v1672_v13 = vld [vmem:[#allocation2 + $0x1c8] sm:$0xff] }
 0x2eb   : > { %2099 = vst [vmem:[#allocation2 + $0x118] sm:$0xff] %v2035_v48  ;;  %v1917_v2 = vpop.f32.mrb[68].mxu0 }
 0x2ec   : > { %v2036_v34 = vadd.f32 %v1917_v2, %v1651_v24  ;;  %v1919_v5 = vpop.f32.mrb[69].mxu0  ;;  %v1673_v2 = vld [vmem:[#allocation2 + $0x1d0] sm:$0xff] }
 0x2ed   : > { %v2037_v41 = vadd.f32 %v1919_v5, %v1652_v27 }
 0x2ee   : > { %2100 = vst [vmem:[#allocation2 + $0x120] sm:$0xff] %v2036_v34  ;;  %v1674_v34 = vld [vmem:[#allocation2 + $0x1d8] sm:$0xff] }
 0x2ef   : > { %2101 = vst [vmem:[#allocation2 + $0x128] sm:$0xff] %v2037_v41  ;;  %v1923_v38 = vpop.f32.mrb[70].mxu0 }
 0x2f0   : > { %v2038_v21 = vadd.f32 %v1923_v38, %v1653_v50  ;;  %v1925_v49 = vpop.f32.mrb[71].mxu0  ;;  %v1675_v38 = vld [vmem:[#allocation2 + $0x1e0] sm:$0xff] }
 0x2f1   : > { %v2039_v61 = vadd.f32 %v1925_v49, %v1654_v20 }
 0x2f2   : > { %2102 = vst [vmem:[#allocation2 + $0x130] sm:$0xff] %v2038_v21  ;;  %v1676_v21 = vld [vmem:[#allocation2 + $0x1e8] sm:$0xff] }
 0x2f3   : > { %2103 = vst [vmem:[#allocation2 + $0x138] sm:$0xff] %v2039_v61  ;;  %v1929_v26 = vpop.f32.mrb[72].mxu0 }
 0x2f4   : > { %v2040_v63 = vadd.f32 %v1929_v26, %v1655_v8  ;;  %v1931_v15 = vpop.f32.mrb[73].mxu0  ;;  %v1677_v26 = vld [vmem:[#allocation2 + $0x1f0] sm:$0xff] }
 0x2f5   : > { %v2041_v60 = vadd.f32 %v1931_v15, %v1656_v62 }
 0x2f6   : > { %2104 = vst [vmem:[#allocation2 + $0x140] sm:$0xff] %v2040_v63  ;;  %v1678_v63 = vld [vmem:[#allocation2 + $0x1f8] sm:$0xff] }
 0x2f7   : > { %2105 = vst [vmem:[#allocation2 + $0x148] sm:$0xff] %v2041_v60  ;;  %v1935_v0 = vpop.f32.mrb[74].mxu0 }
 0x2f8   : > { %v2042_v40 = vadd.f32 %v1935_v0, %v1657_v53  ;;  %v1937_v35 = vpop.f32.mrb[75].mxu0  ;;  %v2132_v0 = vld [vmem:[#allocation2] sm:$0xff] (!%p2538_p4) }
 0x2f9   : > { %v2043_v56 = vadd.f32 %v1937_v35, %v1658_v42  ;;  %v2134_v35 = vld [vmem:[#allocation2 + $0x10] sm:$0xff] (!%p2538_p4)  ;;  %2196 = vst [vmem:[%s3446_s25] sm:$0xff] (!%p2538_p4), %v2132_v0 }
 0x2fa   : > { %2106 = vst [vmem:[#allocation2 + $0x150] sm:$0xff] %v2042_v40  ;;  %v2133_v40 = vld [vmem:[#allocation2 + $0x8] sm:$0xff] (!%p2538_p4)  ;;  %2198 = vst [vmem:[%s3446_s25 + $0x10] sm:$0xff] (!%p2538_p4), %v2134_v35 }
 0x2fb   : > { %2107 = vst [vmem:[#allocation2 + $0x158] sm:$0xff] %v2043_v56  ;;  %v1941_v28 = vpop.f32.mrb[76].mxu0  ;;  %2197 = vst [vmem:[%s3446_s25 + $0x8] sm:$0xff] (!%p2538_p4), %v2133_v40  ;;  %v2135_v56 = vld [vmem:[#allocation2 + $0x18] sm:$0xff] (!%p2538_p4) }
 0x2fc   : > { %v2044_v10 = vadd.f32 %v1941_v28, %v1659_v46  ;;  %v1943_v43 = vpop.f32.mrb[77].mxu0  ;;  %v2136_v46 = vld [vmem:[#allocation2 + $0x20] sm:$0xff] (!%p2538_p4)  ;;  %2199 = vst [vmem:[%s3446_s25 + $0x18] sm:$0xff] (!%p2538_p4), %v2135_v56  ;;  %v2138_v28 = vld [vmem:[#allocation2 + $0x30] sm:$0xff] (!%p2538_p4) }
 0x2fd   : > { %v2045_v4 = vadd.f32 %v1943_v43, %v1660_v11  ;;  %v2137_v11 = vld [vmem:[#allocation2 + $0x28] sm:$0xff] (!%p2538_p4)  ;;  %2200 = vst [vmem:[%s3446_s25 + $0x20] sm:$0xff] (!%p2538_p4), %v2136_v46  ;;  %v2140_v43 = vld [vmem:[#allocation2 + $0x40] sm:$0xff] (!%p2538_p4)  ;;  %2202 = vst [vmem:[%s3446_s25 + $0x30] sm:$0xff] (!%p2538_p4), %v2138_v28 }
 0x2fe   : > { %2108 = vst [vmem:[#allocation2 + $0x160] sm:$0xff] %v2044_v10  ;;  %2201 = vst [vmem:[%s3446_s25 + $0x28] sm:$0xff] (!%p2538_p4), %v2137_v11  ;;  %v2139_v10 = vld [vmem:[#allocation2 + $0x38] sm:$0xff] (!%p2538_p4) }
 0x2ff   : > { %2109 = vst [vmem:[#allocation2 + $0x168] sm:$0xff] %v2045_v4  ;;  %v1947_v29 = vpop.f32.mrb[78].mxu0  ;;  %2203 = vst [vmem:[%s3446_s25 + $0x38] sm:$0xff] (!%p2538_p4), %v2139_v10  ;;  %v2141_v4 = vld [vmem:[#allocation2 + $0x48] sm:$0xff] (!%p2538_p4) }
 0x300   : > { %v2046_v12 = vadd.f32 %v1947_v29, %v1661_v39  ;;  %v1949_v25 = vpop.f32.mrb[79].mxu0  ;;  %2204 = vst [vmem:[%s3446_s25 + $0x40] sm:$0xff] (!%p2538_p4), %v2140_v43  ;;  %v2142_v39 = vld [vmem:[#allocation2 + $0x50] sm:$0xff] (!%p2538_p4)  ;;  %2205 = vst [vmem:[%s3446_s25 + $0x48] sm:$0xff] (!%p2538_p4), %v2141_v4  ;;  %v2144_v29 = vld [vmem:[#allocation2 + $0x60] sm:$0xff] (!%p2538_p4) }
 0x301   : > { %v2047_v19 = vadd.f32 %v1949_v25, %v1662_v6  ;;  %v2143_v6 = vld [vmem:[#allocation2 + $0x58] sm:$0xff] (!%p2538_p4)  ;;  %2206 = vst [vmem:[%s3446_s25 + $0x50] sm:$0xff] (!%p2538_p4), %v2142_v39  ;;  %v2146_v25 = vld [vmem:[#allocation2 + $0x70] sm:$0xff] (!%p2538_p4)  ;;  %2208 = vst [vmem:[%s3446_s25 + $0x60] sm:$0xff] (!%p2538_p4), %v2144_v29 }
 0x302   : > { %2110 = vst [vmem:[#allocation2 + $0x170] sm:$0xff] %v2046_v12  ;;  %2207 = vst [vmem:[%s3446_s25 + $0x58] sm:$0xff] (!%p2538_p4), %v2143_v6  ;;  %v2145_v12 = vld [vmem:[#allocation2 + $0x68] sm:$0xff] (!%p2538_p4) }
 0x303   : > { %2111 = vst [vmem:[#allocation2 + $0x178] sm:$0xff] %v2047_v19  ;;  %v1953_v22 = vpop.f32.mrb[80].mxu0  ;;  %2209 = vst [vmem:[%s3446_s25 + $0x68] sm:$0xff] (!%p2538_p4), %v2145_v12  ;;  %v2147_v19 = vld [vmem:[#allocation2 + $0x78] sm:$0xff] (!%p2538_p4) }
 0x304   : > { %v2048_v59 = vadd.f32 %v1953_v22, %v1663_v36  ;;  %v1955_v7 = vpop.f32.mrb[81].mxu0  ;;  %2210 = vst [vmem:[%s3446_s25 + $0x70] sm:$0xff] (!%p2538_p4), %v2146_v25  ;;  %v2148_v36 = vld [vmem:[#allocation2 + $0x80] sm:$0xff] (!%p2538_p4)  ;;  %2211 = vst [vmem:[%s3446_s25 + $0x78] sm:$0xff] (!%p2538_p4), %v2147_v19  ;;  %v2150_v22 = vld [vmem:[#allocation2 + $0x90] sm:$0xff] (!%p2538_p4) }
 0x305   : > { %v2049_v58 = vadd.f32 %v1955_v7, %v1664_v1  ;;  %v2149_v1 = vld [vmem:[#allocation2 + $0x88] sm:$0xff] (!%p2538_p4)  ;;  %2212 = vst [vmem:[%s3446_s25 + $0x80] sm:$0xff] (!%p2538_p4), %v2148_v36  ;;  %v2152_v7 = vld [vmem:[#allocation2 + $0xa0] sm:$0xff] (!%p2538_p4)  ;;  %2214 = vst [vmem:[%s3446_s25 + $0x90] sm:$0xff] (!%p2538_p4), %v2150_v22 }
 0x306   : > { %2112 = vst [vmem:[#allocation2 + $0x180] sm:$0xff] %v2048_v59  ;;  %2213 = vst [vmem:[%s3446_s25 + $0x88] sm:$0xff] (!%p2538_p4), %v2149_v1  ;;  %v2151_v59 = vld [vmem:[#allocation2 + $0x98] sm:$0xff] (!%p2538_p4) }
 0x307   : > { %2113 = vst [vmem:[#allocation2 + $0x188] sm:$0xff] %v2049_v58  ;;  %v1959_v33 = vpop.f32.mrb[82].mxu0  ;;  %2215 = vst [vmem:[%s3446_s25 + $0x98] sm:$0xff] (!%p2538_p4), %v2151_v59  ;;  %v2153_v58 = vld [vmem:[#allocation2 + $0xa8] sm:$0xff] (!%p2538_p4) }
 0x308   : > { %v2050_v30 = vadd.f32 %v1959_v33, %v1665_v9  ;;  %v1961_v17 = vpop.f32.mrb[83].mxu0  ;;  %2216 = vst [vmem:[%s3446_s25 + $0xa0] sm:$0xff] (!%p2538_p4), %v2152_v7  ;;  %v2154_v9 = vld [vmem:[#allocation2 + $0xb0] sm:$0xff] (!%p2538_p4)  ;;  %2217 = vst [vmem:[%s3446_s25 + $0xa8] sm:$0xff] (!%p2538_p4), %v2153_v58  ;;  %v2156_v33 = vld [vmem:[#allocation2 + $0xc0] sm:$0xff] (!%p2538_p4) }
 0x309   : > { %v2051_v3 = vadd.f32 %v1961_v17, %v1666_v54  ;;  %v2155_v54 = vld [vmem:[#allocation2 + $0xb8] sm:$0xff] (!%p2538_p4)  ;;  %2218 = vst [vmem:[%s3446_s25 + $0xb0] sm:$0xff] (!%p2538_p4), %v2154_v9  ;;  %v2158_v17 = vld [vmem:[#allocation2 + $0xd0] sm:$0xff] (!%p2538_p4)  ;;  %2220 = vst [vmem:[%s3446_s25 + $0xc0] sm:$0xff] (!%p2538_p4), %v2156_v33 }
 0x30a   : > { %2114 = vst [vmem:[#allocation2 + $0x190] sm:$0xff] %v2050_v30  ;;  %2219 = vst [vmem:[%s3446_s25 + $0xb8] sm:$0xff] (!%p2538_p4), %v2155_v54  ;;  %v2157_v30 = vld [vmem:[#allocation2 + $0xc8] sm:$0xff] (!%p2538_p4) }
 0x30b   : > { %2115 = vst [vmem:[#allocation2 + $0x198] sm:$0xff] %v2051_v3  ;;  %v1965_v51 = vpop.f32.mrb[84].mxu0  ;;  %2221 = vst [vmem:[%s3446_s25 + $0xc8] sm:$0xff] (!%p2538_p4), %v2157_v30  ;;  %v2159_v3 = vld [vmem:[#allocation2 + $0xd8] sm:$0xff] (!%p2538_p4) }
 0x30c   : > { %v2052_v47 = vadd.f32 %v1965_v51, %v1667_v37  ;;  %v1967_v23 = vpop.f32.mrb[85].mxu0  ;;  %2222 = vst [vmem:[%s3446_s25 + $0xd0] sm:$0xff] (!%p2538_p4), %v2158_v17  ;;  %v2160_v37 = vld [vmem:[#allocation2 + $0xe0] sm:$0xff] (!%p2538_p4)  ;;  %2223 = vst [vmem:[%s3446_s25 + $0xd8] sm:$0xff] (!%p2538_p4), %v2159_v3  ;;  %v2162_v51 = vld [vmem:[#allocation2 + $0xf0] sm:$0xff] (!%p2538_p4) }
 0x30d   : > { %v2053_v45 = vadd.f32 %v1967_v23, %v1668_v52  ;;  %v2161_v52 = vld [vmem:[#allocation2 + $0xe8] sm:$0xff] (!%p2538_p4)  ;;  %2224 = vst [vmem:[%s3446_s25 + $0xe0] sm:$0xff] (!%p2538_p4), %v2160_v37  ;;  %v2164_v23 = vld [vmem:[#allocation2 + $0x100] sm:$0xff] (!%p2538_p4)  ;;  %2226 = vst [vmem:[%s3446_s25 + $0xf0] sm:$0xff] (!%p2538_p4), %v2162_v51 }
 0x30e   : > { %2116 = vst [vmem:[#allocation2 + $0x1a0] sm:$0xff] %v2052_v47  ;;  %2225 = vst [vmem:[%s3446_s25 + $0xe8] sm:$0xff] (!%p2538_p4), %v2161_v52  ;;  %v2163_v47 = vld [vmem:[#allocation2 + $0xf8] sm:$0xff] (!%p2538_p4) }
 0x30f   : > { %2117 = vst [vmem:[#allocation2 + $0x1a8] sm:$0xff] %v2053_v45  ;;  %v1971_v55 = vpop.f32.mrb[86].mxu0  ;;  %2227 = vst [vmem:[%s3446_s25 + $0xf8] sm:$0xff] (!%p2538_p4), %v2163_v47  ;;  %v2165_v45 = vld [vmem:[#allocation2 + $0x108] sm:$0xff] (!%p2538_p4) }
 0x310   : > { %v2054_v16 = vadd.f32 %v1971_v55, %v1669_v31  ;;  %v1973_v44 = vpop.f32.mrb[87].mxu0  ;;  %2228 = vst [vmem:[%s3446_s25 + $0x100] sm:$0xff] (!%p2538_p4), %v2164_v23  ;;  %v2166_v31 = vld [vmem:[#allocation2 + $0x110] sm:$0xff] (!%p2538_p4)  ;;  %2229 = vst [vmem:[%s3446_s25 + $0x108] sm:$0xff] (!%p2538_p4), %v2165_v45  ;;  %v2168_v55 = vld [vmem:[#allocation2 + $0x120] sm:$0xff] (!%p2538_p4) }
 0x311   : > { %v2055_v57 = vadd.f32 %v1973_v44, %v1670_v14  ;;  %v2167_v14 = vld [vmem:[#allocation2 + $0x118] sm:$0xff] (!%p2538_p4)  ;;  %2230 = vst [vmem:[%s3446_s25 + $0x110] sm:$0xff] (!%p2538_p4), %v2166_v31  ;;  %v2170_v44 = vld [vmem:[#allocation2 + $0x130] sm:$0xff] (!%p2538_p4)  ;;  %2232 = vst [vmem:[%s3446_s25 + $0x120] sm:$0xff] (!%p2538_p4), %v2168_v55 }
 0x312   : > { %2118 = vst [vmem:[#allocation2 + $0x1b0] sm:$0xff] %v2054_v16  ;;  %2231 = vst [vmem:[%s3446_s25 + $0x118] sm:$0xff] (!%p2538_p4), %v2167_v14  ;;  %v2169_v16 = vld [vmem:[#allocation2 + $0x128] sm:$0xff] (!%p2538_p4) }
 0x313   : > { %2119 = vst [vmem:[#allocation2 + $0x1b8] sm:$0xff] %v2055_v57  ;;  %v1977_v32 = vpop.f32.mrb[88].mxu0  ;;  %2233 = vst [vmem:[%s3446_s25 + $0x128] sm:$0xff] (!%p2538_p4), %v2169_v16  ;;  %v2171_v57 = vld [vmem:[#allocation2 + $0x138] sm:$0xff] (!%p2538_p4) }
 0x314   : > { %v2056_v48 = vadd.f32 %v1977_v32, %v1671_v18  ;;  %v1979_v24 = vpop.f32.mrb[89].mxu0  ;;  %2234 = vst [vmem:[%s3446_s25 + $0x130] sm:$0xff] (!%p2538_p4), %v2170_v44  ;;  %v2172_v18 = vld [vmem:[#allocation2 + $0x140] sm:$0xff] (!%p2538_p4)  ;;  %2235 = vst [vmem:[%s3446_s25 + $0x138] sm:$0xff] (!%p2538_p4), %v2171_v57  ;;  %v2174_v32 = vld [vmem:[#allocation2 + $0x150] sm:$0xff] (!%p2538_p4) }
 0x315   : > { %v2057_v27 = vadd.f32 %v1979_v24, %v1672_v13  ;;  %v2173_v13 = vld [vmem:[#allocation2 + $0x148] sm:$0xff] (!%p2538_p4)  ;;  %2236 = vst [vmem:[%s3446_s25 + $0x140] sm:$0xff] (!%p2538_p4), %v2172_v18  ;;  %v2176_v24 = vld [vmem:[#allocation2 + $0x160] sm:$0xff] (!%p2538_p4)  ;;  %2238 = vst [vmem:[%s3446_s25 + $0x150] sm:$0xff] (!%p2538_p4), %v2174_v32 }
 0x316   : > { %2120 = vst [vmem:[#allocation2 + $0x1c0] sm:$0xff] %v2056_v48  ;;  %2237 = vst [vmem:[%s3446_s25 + $0x148] sm:$0xff] (!%p2538_p4), %v2173_v13  ;;  %v2175_v48 = vld [vmem:[#allocation2 + $0x158] sm:$0xff] (!%p2538_p4) }
 0x317   : > { %2121 = vst [vmem:[#allocation2 + $0x1c8] sm:$0xff] %v2057_v27  ;;  %v1983_v5 = vpop.f32.mrb[90].mxu0  ;;  %2239 = vst [vmem:[%s3446_s25 + $0x158] sm:$0xff] (!%p2538_p4), %v2175_v48  ;;  %v2177_v27 = vld [vmem:[#allocation2 + $0x168] sm:$0xff] (!%p2538_p4) }
 0x318   : > { %v2058_v41 = vadd.f32 %v1983_v5, %v1673_v2  ;;  %v1985_v50 = vpop.f32.mrb[91].mxu0  ;;  %2240 = vst [vmem:[%s3446_s25 + $0x160] sm:$0xff] (!%p2538_p4), %v2176_v24  ;;  %v2178_v2 = vld [vmem:[#allocation2 + $0x170] sm:$0xff] (!%p2538_p4)  ;;  %2241 = vst [vmem:[%s3446_s25 + $0x168] sm:$0xff] (!%p2538_p4), %v2177_v27  ;;  %v2180_v5 = vld [vmem:[#allocation2 + $0x180] sm:$0xff] (!%p2538_p4) }
 0x319   : > { %v2059_v20 = vadd.f32 %v1985_v50, %v1674_v34  ;;  %v2179_v34 = vld [vmem:[#allocation2 + $0x178] sm:$0xff] (!%p2538_p4)  ;;  %2242 = vst [vmem:[%s3446_s25 + $0x170] sm:$0xff] (!%p2538_p4), %v2178_v2  ;;  %v2182_v50 = vld [vmem:[#allocation2 + $0x190] sm:$0xff] (!%p2538_p4)  ;;  %2244 = vst [vmem:[%s3446_s25 + $0x180] sm:$0xff] (!%p2538_p4), %v2180_v5 }
 0x31a   : > { %2122 = vst [vmem:[#allocation2 + $0x1d0] sm:$0xff] %v2058_v41  ;;  %2243 = vst [vmem:[%s3446_s25 + $0x178] sm:$0xff] (!%p2538_p4), %v2179_v34  ;;  %v2181_v41 = vld [vmem:[#allocation2 + $0x188] sm:$0xff] (!%p2538_p4) }
 0x31b   : > { %2123 = vst [vmem:[#allocation2 + $0x1d8] sm:$0xff] %v2059_v20  ;;  %v1989_v49 = vpop.f32.mrb[92].mxu0  ;;  %2245 = vst [vmem:[%s3446_s25 + $0x188] sm:$0xff] (!%p2538_p4), %v2181_v41  ;;  %v2183_v20 = vld [vmem:[#allocation2 + $0x198] sm:$0xff] (!%p2538_p4) }
 0x31c   : > { %v2060_v61 = vadd.f32 %v1989_v49, %v1675_v38  ;;  %v1991_v8 = vpop.f32.mrb[93].mxu0  ;;  %2246 = vst [vmem:[%s3446_s25 + $0x190] sm:$0xff] (!%p2538_p4), %v2182_v50  ;;  %v2184_v38 = vld [vmem:[#allocation2 + $0x1a0] sm:$0xff] (!%p2538_p4)  ;;  %2247 = vst [vmem:[%s3446_s25 + $0x198] sm:$0xff] (!%p2538_p4), %v2183_v20  ;;  %v2186_v49 = vld [vmem:[#allocation2 + $0x1b0] sm:$0xff] (!%p2538_p4) }
 0x31d   : > { %v2061_v62 = vadd.f32 %v1991_v8, %v1676_v21  ;;  %2131 = sbr.rel (%p2538_p4) target bundleno = 812 (0x32c), region = 44  ;;  %v2185_v21 = vld [vmem:[#allocation2 + $0x1a8] sm:$0xff] (!%p2538_p4)  ;;  %2248 = vst [vmem:[%s3446_s25 + $0x1a0] sm:$0xff] (!%p2538_p4), %v2184_v38  ;;  %v2188_v8 = vld [vmem:[#allocation2 + $0x1c0] sm:$0xff] (!%p2538_p4)  ;;  %2250 = vst [vmem:[%s3446_s25 + $0x1b0] sm:$0xff] (!%p2538_p4), %v2186_v49 }
 0x31e   : > { %2124 = vst [vmem:[#allocation2 + $0x1e0] sm:$0xff] %v2060_v61  ;;  %2249 = vst [vmem:[%s3446_s25 + $0x1a8] sm:$0xff] (!%p2538_p4), %v2185_v21  ;;  %v2187_v61 = vld [vmem:[#allocation2 + $0x1b8] sm:$0xff] (!%p2538_p4) }
 0x31f   : > { %2125 = vst [vmem:[#allocation2 + $0x1e8] sm:$0xff] %v2061_v62  ;;  %v1995_v15 = vpop.f32.mrb[94].mxu0  ;;  %2251 = vst [vmem:[%s3446_s25 + $0x1b8] sm:$0xff] (!%p2538_p4), %v2187_v61  ;;  %v2189_v62 = vld [vmem:[#allocation2 + $0x1c8] sm:$0xff] (!%p2538_p4) }
 0x320   : > { %v2062_v60 = vadd.f32 %v1995_v15, %v1677_v26  ;;  %v1997_v53 = vpop.f32.mrb[95].mxu0  ;;  %2252 = vst [vmem:[%s3446_s25 + $0x1c0] sm:$0xff] (!%p2538_p4), %v2188_v8  ;;  %2253 = vst [vmem:[%s3446_s25 + $0x1c8] sm:$0xff] (!%p2538_p4), %v2189_v62 }
 0x321   : > { %v2063_v42 = vadd.f32 %v1997_v53, %v1678_v63  ;;  %v2190_v26 = vld [vmem:[#allocation2 + $0x1d0] sm:$0xff] (!%p2538_p4) }
 0x322   : > { %2126 = vst [vmem:[#allocation2 + $0x1f0] sm:$0xff] %v2062_v60  ;;  %v2191_v63 = vld [vmem:[#allocation2 + $0x1d8] sm:$0xff] (!%p2538_p4)  ;;  %2254 = vst [vmem:[%s3446_s25 + $0x1d0] sm:$0xff] (!%p2538_p4), %v2190_v26 }
 0x323   : > { %2127 = vst [vmem:[#allocation2 + $0x1f8] sm:$0xff] %v2063_v42  ;;  %2255 = vst [vmem:[%s3446_s25 + $0x1d8] sm:$0xff] (!%p2538_p4), %v2191_v63 }
 0x325   : > { %v2192_v15 = vld [vmem:[#allocation2 + $0x1e0] sm:$0xff] }
 0x326   : > { %v2193_v60 = vld [vmem:[#allocation2 + $0x1e8] sm:$0xff]  ;;  %2256 = vst [vmem:[%s3446_s25 + $0x1e0] sm:$0xff] %v2192_v15 }
 0x327   : > { %2257 = vst [vmem:[%s3446_s25 + $0x1e8] sm:$0xff] %v2193_v60 }
 0x329   : > { %v2194_v53 = vld [vmem:[#allocation2 + $0x1f0] sm:$0xff] }
 0x32a   : > { %2258 = vst [vmem:[%s3446_s25 + $0x1f0] sm:$0xff] %v2194_v53  ;;  %v2195_v42 = vld [vmem:[#allocation2 + $0x1f8] sm:$0xff] }
 0x32b   : > { %2259 = vst [vmem:[%s3446_s25 + $0x1f8] sm:$0xff] %v2195_v42 }
 0x32c PF: > { %s2549_s2 = sshll.u32 %s3238_s19, 13  ;;  %s2277_s6 = sshll.u32 %s3446_s25, 4  ;;  %s4520_s6 = int_to_ptr.vmem [resolvable:$true] %s2277_s6 }
 0x32d   : > { %s4517_s23 = scalar_lea.hbm %s4588_s3, %s2549_s2  ;;  %s4524_s24 = scalar_lea.sflag [#allocation5], %s245_s26 }
 0x32e   : > { %s3128_s28 = scalar_lea.vmem %s4520_s6, 8192  ;;  %p4674_p1 = scmp.ne.s32.totalorder %s4621_s8, 0 }
 0x32f   : > { %p3129_p0 = scmp.ne.s32.totalorder %s4520_s6, %s3128_s28  ;;  %s3256_s19 = smov [#allocation6]  }
 0x330   : > { %s3132_s27 = sshll.u32 %s3256_s19, 4  ;;  %s3133_s27 = int_to_ptr.vmem [resolvable:$false] %s3132_s27 }
 0x331   : > { %p3130_p5 = pnand %p3129_p0, %p4674_p1  ;;  %s3134_s15 = scalar_lea.vmem %s3133_s27, 16384 }
 0x332   : > { %p3135_p3 = scmp.lt.s32.totalorder %s4520_s6, %s3133_s27  ;;  %p3136_p10 = scmp.lt.s32.totalorder %s3134_s15, %s3128_s28 }
 0x333   : > { %p3131_p7 = pneg %p3130_p5 }
 0x334   : > { %p3137_p11 = por %p3136_p10, %p3135_p3 }
 0x336   : > { %p3138_p6 = pnand %p3137_p11, %p3131_p7 }
 0x338   : > { %3141 = shalt.err (!%p3138_p6)
}
 0x339   : > { %s3142_s25 = scalar_lea.hbm %s4517_s23, 8192  ;;  %s3146_s4 = scalar_lea.hbm %s4588_s3, 16384 }
 0x33a   : > { %p3143_p9 = scmp.ne.s32.totalorder %s4517_s23, %s3142_s25  ;;  %p3147_p2 = scmp.lt.u32.totalorder %s4517_s23, %s4588_s3 }
 0x33b   : > { %p3148_p8 = scmp.lt.u32.totalorder %s3146_s4, %s3142_s25  ;;  %p3150_p0 = scmp.lt.u32.totalorder %s3142_s25, %s4517_s23 }
 0x33c   : > { %p3144_p13 = pnand %p3143_p9, %p4674_p1 }
 0x33d   : > { %p3149_p4 = por %p3148_p8, %p3147_p2 }
 0x33e   : > { %p3145_p12 = pneg %p3144_p13 }
 0x33f   : > { %p3151_p5 = por %p3150_p0, %p3149_p4 }
 0x341   : > { %p3152_p7 = pnand %p3151_p5, %p3145_p12 }
 0x343   : > { %3155 = shalt.err (!%p3152_p7)
}
 0x344   : > { %s3257_s2 = smov 256   ;;  %s3258_s18 = smov 16  }
 0x345   : > { %2737 = dma.vmem_to_hbm [thread:$0]  (%p4674_p1), %s4520_s6, 8192, %s4517_s23, %s4524_s24, %s3257_s2, %s3257_s2, %s3258_s18  }
 0x346 PF: > { %p2748_p3 = scmp.ge.s32.totalorder %s3250_s22, 2  ;;  %s2292_s29 = sand.u32 1, %s3210_s12  }
 0x347   : > { %p4675_p10 = scmp.ne.s32.totalorder %s4622_s10, 0  ;;  %s2293_s28 = scalar_lea.sflag [#allocation5], %s2292_s29 }
 0x349   : > { %p2744_p11 = pnand %p2748_p3, %p4675_p10 }
 0x34b   : > { %3205 = dma.done.wait (!%p2744_p11), %s2293_s28, 8192  }
 0x34c   : > { %3207 = vsyncadd (!%p2744_p11), %s2293_s28, 4294959104  ;;  %s19_s22 = sadd.s32 1, %s3250_s22   ;;  %s4676_s8 = sld [smem:[#allocation9_spill]] }
 0x34d   : > { %p16_p6 = scmp.ge.s32.totalorder %s19_s22, 6   ;;  %s4677_s23 = sld [smem:[#allocation10_spill]] }
 0x34e   : > { %s4678_s12 = smov %s3214_s13  ;;  %s4679_s13 = smov %s3218_s14 }
 0x34f   : > { %s4680_s14 = smov %s3365_s7  ;;  %s4681_s15 = smov %s3226_s16 }
 0x350   : > { %s4682_s16 = smov %s3230_s17  ;;  %s4683_s17 = smov %s3353_s30 }
 0x351   : > { %s4684_s18 = smov %s3242_s20  ;;  %s4685_s19 = smov %s3246_s21 }
 0x352   : > { %s4686_s20 = smov %s4676_s8  ;;  %18 = sbr.rel (!%p16_p6) target bundleno = 11 (0xb), region = 91 }
 0x353   : > { %s4687_s21 = smov %s4677_s23 }
 0x359   :  { %2298 = vsyncpa [#allocation4], 1 }
 0x35a   :  { %2300 = vsyncpa [#allocation4 + $0x1], 1 }
 0x35b   :  { %2301 = vsyncpa [#allocation5], 1 }
 0x35c   :  { %2303 = vsyncpa [#allocation5 + $0x1], 1 }

</bundles_post_ra>
